<compile_context>
chip_gen: v7x
topology: tpu7x:2x2x1
jax: 0.10.0
libtpu: 0.0.40
codegen_flags: <defaults>
</compile_context>

<pallas_src>
import jax
import jax.numpy as jnp
from jax import lax
from jax.experimental import pallas as pl
from jax.experimental.pallas import tpu as pltpu


def _round_up(x, m):
    return ((x + m - 1) // m) * m


# ----------------------------------------------------------------------------
# Kernel 1: GRU recurrence with hoisted input projection
# ----------------------------------------------------------------------------
def gru_kernel(x_ref, wih_ref, whh_ref, bih_ref, bhh_ref, hs_ref, h_sc, gx_sc):
    # x_ref:   (Tt*Bp, Ep)   time-major, batch fastest within a timestep
    # wih_ref: (Ep, 3*Hp)    gate blocks [r | z | n], each lane-aligned (Hp wide)
    # whh_ref: (Hp, 3*Hp)
    # bih_ref / bhh_ref: (1, 3*Hp)
    # hs_ref:  (Tt*Bp, Hp)   hidden states for this T-tile (output)
    # h_sc:    (Bp, Hp)      hidden state carried across grid steps (scratch)
    # gx_sc:   (Tt*Bp, 3*Hp) precomputed input gates (scratch)
    rows = x_ref.shape[0]
    Hp = whh_ref.shape[0]
    Bp = h_sc.shape[0]
    Tt = rows // Bp

    @pl.when(pl.program_id(0) == 0)
    def _():
        h_sc[...] = jnp.zeros_like(h_sc)

    # Hoisted input projection: ONE large lane-aligned MXU matmul per T-tile
    # (replaces Tt tiny per-step matmuls + Tt bias broadcasts).
    gx_sc[...] = (
        jnp.dot(x_ref[...], wih_ref[...], preferred_element_type=jnp.float32)
        + bih_ref[...])

    # Loop-invariant loads / broadcasts hoisted out of the recurrence.
    whh = whh_ref[...]
    bhh = jnp.broadcast_to(bhh_ref[...], (Bp, 3 * Hp))

    # Short static recurrence: fully unrolled so the scheduler can overlap the
    # next step's gh matmul with the current step's VPU/EUP gate math.
    h = h_sc[...]
    for t in range(Tt):
        gxt = gx_sc[t * Bp:(t + 1) * Bp, :]                           # (Bp, 3Hp)
        gh = jnp.dot(h, whh, preferred_element_type=jnp.float32) + bhh
        r = jax.nn.sigmoid(gxt[:, 0:Hp] + gh[:, 0:Hp])
        z = jax.nn.sigmoid(gxt[:, Hp:2 * Hp] + gh[:, Hp:2 * Hp])
        n = jnp.tanh(gxt[:, 2 * Hp:] + r * gh[:, 2 * Hp:])
        h = (1.0 - z) * n + z * h                                     # (Bp, Hp)
        hs_ref[t * Bp:(t + 1) * Bp, :] = h
    h_sc[...] = h


# ----------------------------------------------------------------------------
# Kernel 2: output projection (lane-dense, tiled over T-tiles x V-tiles)
# ----------------------------------------------------------------------------
def fc_head_kernel(hs_ref, wfc_ref, bfc_ref, o_ref):
    o_ref[...] = (
        jnp.dot(hs_ref[...], wfc_ref[...], preferred_element_type=jnp.float32)
        + bfc_ref[...])


# ----------------------------------------------------------------------------
# Wrapper: embedding gather, padding / packing, two pallas_calls
# ----------------------------------------------------------------------------
def tamer_decoder_forward(params, encoder_out, tgt_seq):
    # encoder_out is unused by the reference forward as well.
    del encoder_out
    B, T = tgt_seq.shape
    E = params["embed"].shape[1]
    H = E
    V = params["fc_w"].shape[0]

    # Lane/sublane-aligned padded sizes.
    Hp = _round_up(H, 128)
    Ep = _round_up(E, 128)
    Vp = _round_up(V, 128)
    Bp = _round_up(B, 8)
    Tt = min(T, 16)                               # timesteps per grid tile
    Tp = _round_up(T, Tt)
    rows_t = Tt * Bp                              # rows per tile (flattened)
    Vt = next(c for c in (512, 256, 128) if Vp % c == 0)

    f32 = jnp.float32

    # --- wrapper glue: embedding gather + positional add, layout & padding ---
    x = jnp.take(params["embed"], tgt_seq, axis=0).astype(f32)        # (B, T, E)
    x = x + params["pos_embed"][:, :T, :].astype(f32)
    # dropout = identity (eval mode)
    x = jnp.transpose(x, (1, 0, 2))                                   # (T, B, E)
    x = jnp.pad(x, ((0, Tp - T), (0, Bp - B), (0, Ep - E)))
    x = x.reshape(Tp * Bp, Ep)

    # --- parameter packing: each gate gets its own lane-aligned Hp block -----
    def pack_gate_w(w, in_dim, in_pad):           # (3H, in_dim) -> (in_pad, 3*Hp)
        wg = w.astype(f32).reshape(3, H, in_dim)
        wg = jnp.pad(wg, ((0, 0), (0, Hp - H), (0, in_pad - in_dim)))
        return jnp.transpose(wg, (2, 0, 1)).reshape(in_pad, 3 * Hp)

    def pack_gate_b(b):                           # (3H,) -> (1, 3*Hp)
        bg = jnp.pad(b.astype(f32).reshape(3, H), ((0, 0), (0, Hp - H)))
        return bg.reshape(1, 3 * Hp)

    wih = pack_gate_w(params["w_ih"], E, Ep)
    whh = pack_gate_w(params["w_hh"], H, Hp)
    bih = pack_gate_b(params["b_ih"])
    bhh = pack_gate_b(params["b_hh"])
    wfc = jnp.pad(params["fc_w"].astype(f32).T, ((0, Hp - H), (0, Vp - V)))
    bfc = jnp.pad(params["fc_b"].astype(f32), (0, Vp - V))[None, :]

    # --- kernel 1: GRU recurrence (grid over T-tiles, sequential carry) ------
    hs = pl.pallas_call(
        gru_kernel,
        out_shape=jax.ShapeDtypeStruct((Tp * Bp, Hp), f32),
        grid_spec=pltpu.PrefetchScalarGridSpec(
            num_scalar_prefetch=0,
            grid=(Tp // Tt,),
            in_specs=[
                pl.BlockSpec((rows_t, Ep), lambda i: (i, 0)),
                pl.BlockSpec((Ep, 3 * Hp), lambda i: (0, 0)),
                pl.BlockSpec((Hp, 3 * Hp), lambda i: (0, 0)),
                pl.BlockSpec((1, 3 * Hp), lambda i: (0, 0)),
                pl.BlockSpec((1, 3 * Hp), lambda i: (0, 0)),
            ],
            out_specs=pl.BlockSpec((rows_t, Hp), lambda i: (i, 0)),
            scratch_shapes=[
                pltpu.VMEM((Bp, Hp), f32),             # carried hidden state
                pltpu.VMEM((rows_t, 3 * Hp), f32),     # hoisted input gates
            ],
        ),
        compiler_params=pltpu.CompilerParams(
            dimension_semantics=("arbitrary",),        # sequential carry over T
            vmem_limit_bytes=32 * 1024 * 1024,
        ),
    )(x, wih, whh, bih, bhh)

    # --- kernel 2: output projection (grid over T-tiles x V-tiles) -----------
    logits_flat = pl.pallas_call(
        fc_head_kernel,
        out_shape=jax.ShapeDtypeStruct((Tp * Bp, Vp), f32),
        grid_spec=pltpu.PrefetchScalarGridSpec(
            num_scalar_prefetch=0,
            grid=(Tp // Tt, Vp // Vt),
            in_specs=[
                pl.BlockSpec((rows_t, Hp), lambda i, j: (i, 0)),
                pl.BlockSpec((Hp, Vt), lambda i, j: (0, j)),
                pl.BlockSpec((1, Vt), lambda i, j: (0, j)),
            ],
            out_specs=pl.BlockSpec((rows_t, Vt), lambda i, j: (i, j)),
        ),
        compiler_params=pltpu.CompilerParams(
            dimension_semantics=("parallel", "parallel"),
            vmem_limit_bytes=32 * 1024 * 1024,
        ),
    )(hs, wfc, bfc)

    # Un-pad and return batch-first logits (B, T, V).
    logits = logits_flat.reshape(Tp, Bp, Vp)
    logits = jnp.transpose(logits, (1, 0, 2))[:B, :T, :V]
    return logits


# ----------------------------------------------------------------------------
# Pure-JAX reference (PyTorch GRU semantics) for verification
# ----------------------------------------------------------------------------
def ref_forward(params, tgt_seq):
    B, T = tgt_seq.shape
    H = params["w_hh"].shape[1]
    x = jnp.take(params["embed"], tgt_seq, axis=0) + params["pos_embed"][:, :T, :]

    w_ih, w_hh = params["w_ih"], params["w_hh"]
    b_ih, b_hh = params["b_ih"], params["b_hh"]

    def cell(h, x_t):
        gx = x_t @ w_ih.T + b_ih
        gh = h @ w_hh.T + b_hh
        r = jax.nn.sigmoid(gx[:, :H] + gh[:, :H])
        z = jax.nn.sigmoid(gx[:, H:2 * H] + gh[:, H:2 * H])
        n = jnp.tanh(gx[:, 2 * H:] + r * gh[:, 2 * H:])
        h_new = (1.0 - z) * n + z * h
        return h_new, h_new

    _, hs = lax.scan(cell, jnp.zeros((B, H), jnp.float32),
                     jnp.transpose(x, (1, 0, 2)))
    hs = jnp.transpose(hs, (1, 0, 2))                                 # (B, T, H)
    return hs @ params["fc_w"].T + params["fc_b"]


# ----------------------------------------------------------------------------
def init_params(key, vocab_size, embed_dim, max_len):
    ks = jax.random.split(key, 8)
    H = embed_dim
    return {
        "embed":     0.1 * jax.random.normal(ks[0], (vocab_size, embed_dim), jnp.float32),
        "pos_embed": 0.1 * jax.random.normal(ks[1], (1, max_len, embed_dim), jnp.float32),
        "w_ih":      0.1 * jax.random.normal(ks[2], (3 * H, embed_dim), jnp.float32),
        "w_hh":      0.1 * jax.random.normal(ks[3], (3 * H, H), jnp.float32),
        "b_ih":      0.1 * jax.random.normal(ks[4], (3 * H,), jnp.float32),
        "b_hh":      0.1 * jax.random.normal(ks[5], (3 * H,), jnp.float32),
        "fc_w":      0.1 * jax.random.normal(ks[6], (vocab_size, H), jnp.float32),
        "fc_b":      0.1 * jax.random.normal(ks[7], (vocab_size,), jnp.float32),
    }


if __name__ == "__main__":
    vocab_size, embed_dim, max_len = 40, 32, 256
    B, T = 2, 8

    key = jax.random.PRNGKey(0)
    k_par, k_seq, k_enc = jax.random.split(key, 3)
    params = init_params(k_par, vocab_size, embed_dim, max_len)

    tgt_seq = jax.random.randint(k_seq, (B, T), 0, vocab_size, dtype=jnp.int32)
    encoder_out = jax.random.normal(k_enc, (B, 16, embed_dim), jnp.float32)  # unused

    fwd = jax.jit(tamer_decoder_forward)
    logits = jax.block_until_ready(fwd(params, encoder_out, tgt_seq))

    ref = jax.block_until_ready(ref_forward(params, tgt_seq))
    assert logits.shape == (B, T, vocab_size)
    assert jnp.allclose(logits, ref, atol=1e-4, rtol=1e-4)

    # TODO(synk): train-mode dropout (stateful RNG masking) not implemented; eval semantics used.
    print("KERNEL_OK")
</pallas_src>

<mosaic_0001>
module attributes {stable_mosaic.version = 11 : i64} {
  func.func @gru_kernel(%arg0: i32, %arg1: memref<64x128xf32, #tpu.memory_space<vmem>>, %arg2: memref<128x384xf32, #tpu.memory_space<vmem>>, %arg3: memref<128x384xf32, #tpu.memory_space<vmem>>, %arg4: memref<1x384xf32, #tpu.memory_space<vmem>>, %arg5: memref<1x384xf32, #tpu.memory_space<vmem>>, %arg6: memref<64x128xf32, #tpu.memory_space<vmem>>, %arg7: memref<8x128xf32, #tpu.memory_space<vmem>>, %arg8: memref<64x384xf32, #tpu.memory_space<vmem>>) attributes {dimension_semantics = [#tpu.dimension_semantics<arbitrary>], iteration_bounds = array<i64: 1>, scalar_prefetch = 0 : i64, scratch_operands = 2 : i64, tpu.core_type = #tpu.core_type<tc>, window_params = [{transform_indices = @transform_0, window_bounds = array<i64: 64, 128>}, {pipeline_mode = #tpu.pipeline_mode<synchronous>, transform_indices = @transform_1, window_bounds = array<i64: 128, 384>}, {pipeline_mode = #tpu.pipeline_mode<synchronous>, transform_indices = @transform_2, window_bounds = array<i64: 128, 384>}, {pipeline_mode = #tpu.pipeline_mode<synchronous>, transform_indices = @transform_3, window_bounds = array<i64: 1, 384>}, {pipeline_mode = #tpu.pipeline_mode<synchronous>, transform_indices = @transform_4, window_bounds = array<i64: 1, 384>}, {transform_indices = @transform_5, window_bounds = array<i64: 64, 128>}]} {
    %c0_i32 = arith.constant 0 : i32
    %0 = arith.cmpi eq, %arg0, %c0_i32 : i32
    %1 = arith.extui %0 : i1 to i32
    %c0_i32_0 = arith.constant 0 : i32
    %2 = arith.cmpi ne, %1, %c0_i32_0 : i32
    scf.if %2 {
      %cst_73 = arith.constant 0.000000e+00 : f32
      %256 = vector.broadcast %cst_73 : f32 to vector<8x128xf32>
      %c0_74 = arith.constant 0 : index
      %c0_75 = arith.constant 0 : index
      %257 = vector.load %arg7[%c0_74, %c0_75] : memref<8x128xf32, #tpu.memory_space<vmem>>, vector<8x128xf32>
      tpu.vector_store %arg7[%c0_74, %c0_75], %256 {strides = array<i32>} : memref<8x128xf32, #tpu.memory_space<vmem>>, vector<8x128xf32>,
    } else {
    }
    %c0 = arith.constant 0 : index
    %c0_1 = arith.constant 0 : index
    %3 = vector.load %arg1[%c0, %c0_1] : memref<64x128xf32, #tpu.memory_space<vmem>>, vector<64x128xf32>
    %c0_2 = arith.constant 0 : index
    %c0_3 = arith.constant 0 : index
    %4 = vector.load %arg2[%c0_2, %c0_3] : memref<128x384xf32, #tpu.memory_space<vmem>>, vector<128x384xf32>
    %cst = arith.constant dense<0.000000e+00> : vector<64x384xf32>
    %5 = tpu.matmul %3, %4, %cst {dimension_numbers = #tpu.dot_dimension_numbers<[1], [0], [0], [1], [0, 0, 1, 1], [], []>} : vector<64x128xf32>, vector<128x384xf32>, vector<64x384xf32> -> vector<64x384xf32>
    %c0_4 = arith.constant 0 : index
    %c0_5 = arith.constant 0 : index
    %6 = vector.load %arg4[%c0_4, %c0_5] : memref<1x384xf32, #tpu.memory_space<vmem>>, vector<1x384xf32>
    %7 = vector.broadcast %6 : vector<1x384xf32> to vector<64x384xf32>
    %8 = arith.addf %5, %7 : vector<64x384xf32>
    %c0_6 = arith.constant 0 : index
    %c0_7 = arith.constant 0 : index
    %9 = vector.load %arg8[%c0_6, %c0_7] : memref<64x384xf32, #tpu.memory_space<vmem>>, vector<64x384xf32>
    tpu.vector_store %arg8[%c0_6, %c0_7], %8 {strides = array<i32>} : memref<64x384xf32, #tpu.memory_space<vmem>>, vector<64x384xf32>,
    %c0_8 = arith.constant 0 : index
    %c0_9 = arith.constant 0 : index
    %10 = vector.load %arg3[%c0_8, %c0_9] : memref<128x384xf32, #tpu.memory_space<vmem>>, vector<128x384xf32>
    %c0_10 = arith.constant 0 : index
    %c0_11 = arith.constant 0 : index
    %11 = vector.load %arg5[%c0_10, %c0_11] : memref<1x384xf32, #tpu.memory_space<vmem>>, vector<1x384xf32>
    %12 = vector.shape_cast %11 : vector<1x384xf32> to vector<1x384xf32>
    %13 = vector.broadcast %12 : vector<1x384xf32> to vector<8x384xf32>
    %c0_12 = arith.constant 0 : index
    %c0_13 = arith.constant 0 : index
    %14 = vector.load %arg7[%c0_12, %c0_13] : memref<8x128xf32, #tpu.memory_space<vmem>>, vector<8x128xf32>
    %c0_14 = arith.constant 0 : index
    %c0_15 = arith.constant 0 : index
    %15 = vector.load %arg8[%c0_14, %c0_15] : memref<64x384xf32, #tpu.memory_space<vmem>>, vector<8x384xf32>
    %cst_16 = arith.constant dense<0.000000e+00> : vector<8x384xf32>
    %16 = tpu.matmul %14, %10, %cst_16 {dimension_numbers = #tpu.dot_dimension_numbers<[1], [0], [0], [1], [0, 0, 1, 1], [], []>} : vector<8x128xf32>, vector<128x384xf32>, vector<8x384xf32> -> vector<8x384xf32>
    %17 = arith.addf %16, %13 : vector<8x384xf32>
    %18 = vector.extract_strided_slice %15 {offsets = [0, 0], sizes = [8, 128], strides = [1, 1]} : vector<8x384xf32> to vector<8x128xf32>
    %19 = vector.extract_strided_slice %17 {offsets = [0, 0], sizes = [8, 128], strides = [1, 1]} : vector<8x384xf32> to vector<8x128xf32>
    %20 = arith.addf %18, %19 : vector<8x128xf32>
    %21 = arith.negf %20 : vector<8x128xf32>
    %22 = math.exp %21 : vector<8x128xf32>
    %cst_17 = arith.constant 1.000000e+00 : f32
    %23 = vector.broadcast %cst_17 : f32 to vector<8x128xf32>
    %24 = arith.addf %23, %22 : vector<8x128xf32>
    %25 = arith.divf %23, %24 : vector<8x128xf32>
    %26 = vector.extract_strided_slice %15 {offsets = [0, 128], sizes = [8, 128], strides = [1, 1]} : vector<8x384xf32> to vector<8x128xf32>
    %27 = vector.extract_strided_slice %17 {offsets = [0, 128], sizes = [8, 128], strides = [1, 1]} : vector<8x384xf32> to vector<8x128xf32>
    %28 = arith.addf %26, %27 : vector<8x128xf32>
    %29 = arith.negf %28 : vector<8x128xf32>
    %30 = math.exp %29 : vector<8x128xf32>
    %cst_18 = arith.constant 1.000000e+00 : f32
    %31 = vector.broadcast %cst_18 : f32 to vector<8x128xf32>
    %32 = arith.addf %31, %30 : vector<8x128xf32>
    %33 = arith.divf %31, %32 : vector<8x128xf32>
    %34 = vector.extract_strided_slice %15 {offsets = [0, 256], sizes = [8, 128], strides = [1, 1]} : vector<8x384xf32> to vector<8x128xf32>
    %35 = vector.extract_strided_slice %17 {offsets = [0, 256], sizes = [8, 128], strides = [1, 1]} : vector<8x384xf32> to vector<8x128xf32>
    %36 = arith.mulf %25, %35 : vector<8x128xf32>
    %37 = arith.addf %34, %36 : vector<8x128xf32>
    %38 = math.tanh %37 : vector<8x128xf32>
    %cst_19 = arith.constant 1.000000e+00 : f32
    %39 = vector.broadcast %cst_19 : f32 to vector<8x128xf32>
    %40 = arith.subf %39, %33 : vector<8x128xf32>
    %41 = arith.mulf %40, %38 : vector<8x128xf32>
    %42 = arith.mulf %33, %14 : vector<8x128xf32>
    %43 = arith.addf %41, %42 : vector<8x128xf32>
    %c0_20 = arith.constant 0 : index
    %c0_21 = arith.constant 0 : index
    %44 = vector.load %arg6[%c0_20, %c0_21] : memref<64x128xf32, #tpu.memory_space<vmem>>, vector<8x128xf32>
    tpu.vector_store %arg6[%c0_20, %c0_21], %43 {strides = array<i32>} : memref<64x128xf32, #tpu.memory_space<vmem>>, vector<8x128xf32>,
    %c8 = arith.constant 8 : index
    %c0_22 = arith.constant 0 : index
    %45 = vector.load %arg8[%c8, %c0_22] : memref<64x384xf32, #tpu.memory_space<vmem>>, vector<8x384xf32>
    %cst_23 = arith.constant dense<0.000000e+00> : vector<8x384xf32>
    %46 = tpu.matmul %43, %10, %cst_23 {dimension_numbers = #tpu.dot_dimension_numbers<[1], [0], [0], [1], [0, 0, 1, 1], [], []>} : vector<8x128xf32>, vector<128x384xf32>, vector<8x384xf32> -> vector<8x384xf32>
    %47 = arith.addf %46, %13 : vector<8x384xf32>
    %48 = vector.extract_strided_slice %45 {offsets = [0, 0], sizes = [8, 128], strides = [1, 1]} : vector<8x384xf32> to vector<8x128xf32>
    %49 = vector.extract_strided_slice %47 {offsets = [0, 0], sizes = [8, 128], strides = [1, 1]} : vector<8x384xf32> to vector<8x128xf32>
    %50 = arith.addf %48, %49 : vector<8x128xf32>
    %51 = arith.negf %50 : vector<8x128xf32>
    %52 = math.exp %51 : vector<8x128xf32>
    %cst_24 = arith.constant 1.000000e+00 : f32
    %53 = vector.broadcast %cst_24 : f32 to vector<8x128xf32>
    %54 = arith.addf %53, %52 : vector<8x128xf32>
    %55 = arith.divf %53, %54 : vector<8x128xf32>
    %56 = vector.extract_strided_slice %45 {offsets = [0, 128], sizes = [8, 128], strides = [1, 1]} : vector<8x384xf32> to vector<8x128xf32>
    %57 = vector.extract_strided_slice %47 {offsets = [0, 128], sizes = [8, 128], strides = [1, 1]} : vector<8x384xf32> to vector<8x128xf32>
    %58 = arith.addf %56, %57 : vector<8x128xf32>
    %59 = arith.negf %58 : vector<8x128xf32>
    %60 = math.exp %59 : vector<8x128xf32>
    %cst_25 = arith.constant 1.000000e+00 : f32
    %61 = vector.broadcast %cst_25 : f32 to vector<8x128xf32>
    %62 = arith.addf %61, %60 : vector<8x128xf32>
    %63 = arith.divf %61, %62 : vector<8x128xf32>
    %64 = vector.extract_strided_slice %45 {offsets = [0, 256], sizes = [8, 128], strides = [1, 1]} : vector<8x384xf32> to vector<8x128xf32>
    %65 = vector.extract_strided_slice %47 {offsets = [0, 256], sizes = [8, 128], strides = [1, 1]} : vector<8x384xf32> to vector<8x128xf32>
    %66 = arith.mulf %55, %65 : vector<8x128xf32>
    %67 = arith.addf %64, %66 : vector<8x128xf32>
    %68 = math.tanh %67 : vector<8x128xf32>
    %cst_26 = arith.constant 1.000000e+00 : f32
    %69 = vector.broadcast %cst_26 : f32 to vector<8x128xf32>
    %70 = arith.subf %69, %63 : vector<8x128xf32>
    %71 = arith.mulf %70, %68 : vector<8x128xf32>
    %72 = arith.mulf %63, %43 : vector<8x128xf32>
    %73 = arith.addf %71, %72 : vector<8x128xf32>
    %c8_27 = arith.constant 8 : index
    %c0_28 = arith.constant 0 : index
    %74 = vector.load %arg6[%c8_27, %c0_28] : memref<64x128xf32, #tpu.memory_space<vmem>>, vector<8x128xf32>
    tpu.vector_store %arg6[%c8_27, %c0_28], %73 {strides = array<i32>} : memref<64x128xf32, #tpu.memory_space<vmem>>, vector<8x128xf32>,
    %c16 = arith.constant 16 : index
    %c0_29 = arith.constant 0 : index
    %75 = vector.load %arg8[%c16, %c0_29] : memref<64x384xf32, #tpu.memory_space<vmem>>, vector<8x384xf32>
    %cst_30 = arith.constant dense<0.000000e+00> : vector<8x384xf32>
    %76 = tpu.matmul %73, %10, %cst_30 {dimension_numbers = #tpu.dot_dimension_numbers<[1], [0], [0], [1], [0, 0, 1, 1], [], []>} : vector<8x128xf32>, vector<128x384xf32>, vector<8x384xf32> -> vector<8x384xf32>
    %77 = arith.addf %76, %13 : vector<8x384xf32>
    %78 = vector.extract_strided_slice %75 {offsets = [0, 0], sizes = [8, 128], strides = [1, 1]} : vector<8x384xf32> to vector<8x128xf32>
    %79 = vector.extract_strided_slice %77 {offsets = [0, 0], sizes = [8, 128], strides = [1, 1]} : vector<8x384xf32> to vector<8x128xf32>
    %80 = arith.addf %78, %79 : vector<8x128xf32>
    %81 = arith.negf %80 : vector<8x128xf32>
    %82 = math.exp %81 : vector<8x128xf32>
    %cst_31 = arith.constant 1.000000e+00 : f32
    %83 = vector.broadcast %cst_31 : f32 to vector<8x128xf32>
    %84 = arith.addf %83, %82 : vector<8x128xf32>
    %85 = arith.divf %83, %84 : vector<8x128xf32>
    %86 = vector.extract_strided_slice %75 {offsets = [0, 128], sizes = [8, 128], strides = [1, 1]} : vector<8x384xf32> to vector<8x128xf32>
    %87 = vector.extract_strided_slice %77 {offsets = [0, 128], sizes = [8, 128], strides = [1, 1]} : vector<8x384xf32> to vector<8x128xf32>
    %88 = arith.addf %86, %87 : vector<8x128xf32>
    %89 = arith.negf %88 : vector<8x128xf32>
    %90 = math.exp %89 : vector<8x128xf32>
    %cst_32 = arith.constant 1.000000e+00 : f32
    %91 = vector.broadcast %cst_32 : f32 to vector<8x128xf32>
    %92 = arith.addf %91, %90 : vector<8x128xf32>
    %93 = arith.divf %91, %92 : vector<8x128xf32>
    %94 = vector.extract_strided_slice %75 {offsets = [0, 256], sizes = [8, 128], strides = [1, 1]} : vector<8x384xf32> to vector<8x128xf32>
    %95 = vector.extract_strided_slice %77 {offsets = [0, 256], sizes = [8, 128], strides = [1, 1]} : vector<8x384xf32> to vector<8x128xf32>
    %96 = arith.mulf %85, %95 : vector<8x128xf32>
    %97 = arith.addf %94, %96 : vector<8x128xf32>
    %98 = math.tanh %97 : vector<8x128xf32>
    %cst_33 = arith.constant 1.000000e+00 : f32
    %99 = vector.broadcast %cst_33 : f32 to vector<8x128xf32>
    %100 = arith.subf %99, %93 : vector<8x128xf32>
    %101 = arith.mulf %100, %98 : vector<8x128xf32>
    %102 = arith.mulf %93, %73 : vector<8x128xf32>
    %103 = arith.addf %101, %102 : vector<8x128xf32>
    %c16_34 = arith.constant 16 : index
    %c0_35 = arith.constant 0 : index
    %104 = vector.load %arg6[%c16_34, %c0_35] : memref<64x128xf32, #tpu.memory_space<vmem>>, vector<8x128xf32>
    tpu.vector_store %arg6[%c16_34, %c0_35], %103 {strides = array<i32>} : memref<64x128xf32, #tpu.memory_space<vmem>>, vector<8x128xf32>,
    %c24 = arith.constant 24 : index
    %c0_36 = arith.constant 0 : index
    %105 = vector.load %arg8[%c24, %c0_36] : memref<64x384xf32, #tpu.memory_space<vmem>>, vector<8x384xf32>
    %cst_37 = arith.constant dense<0.000000e+00> : vector<8x384xf32>
    %106 = tpu.matmul %103, %10, %cst_37 {dimension_numbers = #tpu.dot_dimension_numbers<[1], [0], [0], [1], [0, 0, 1, 1], [], []>} : vector<8x128xf32>, vector<128x384xf32>, vector<8x384xf32> -> vector<8x384xf32>
    %107 = arith.addf %106, %13 : vector<8x384xf32>
    %108 = vector.extract_strided_slice %105 {offsets = [0, 0], sizes = [8, 128], strides = [1, 1]} : vector<8x384xf32> to vector<8x128xf32>
    %109 = vector.extract_strided_slice %107 {offsets = [0, 0], sizes = [8, 128], strides = [1, 1]} : vector<8x384xf32> to vector<8x128xf32>
    %110 = arith.addf %108, %109 : vector<8x128xf32>
    %111 = arith.negf %110 : vector<8x128xf32>
    %112 = math.exp %111 : vector<8x128xf32>
    %cst_38 = arith.constant 1.000000e+00 : f32
    %113 = vector.broadcast %cst_38 : f32 to vector<8x128xf32>
    %114 = arith.addf %113, %112 : vector<8x128xf32>
    %115 = arith.divf %113, %114 : vector<8x128xf32>
    %116 = vector.extract_strided_slice %105 {offsets = [0, 128], sizes = [8, 128], strides = [1, 1]} : vector<8x384xf32> to vector<8x128xf32>
    %117 = vector.extract_strided_slice %107 {offsets = [0, 128], sizes = [8, 128], strides = [1, 1]} : vector<8x384xf32> to vector<8x128xf32>
    %118 = arith.addf %116, %117 : vector<8x128xf32>
    %119 = arith.negf %118 : vector<8x128xf32>
    %120 = math.exp %119 : vector<8x128xf32>
    %cst_39 = arith.constant 1.000000e+00 : f32
    %121 = vector.broadcast %cst_39 : f32 to vector<8x128xf32>
    %122 = arith.addf %121, %120 : vector<8x128xf32>
    %123 = arith.divf %121, %122 : vector<8x128xf32>
    %124 = vector.extract_strided_slice %105 {offsets = [0, 256], sizes = [8, 128], strides = [1, 1]} : vector<8x384xf32> to vector<8x128xf32>
    %125 = vector.extract_strided_slice %107 {offsets = [0, 256], sizes = [8, 128], strides = [1, 1]} : vector<8x384xf32> to vector<8x128xf32>
    %126 = arith.mulf %115, %125 : vector<8x128xf32>
    %127 = arith.addf %124, %126 : vector<8x128xf32>
    %128 = math.tanh %127 : vector<8x128xf32>
    %cst_40 = arith.constant 1.000000e+00 : f32
    %129 = vector.broadcast %cst_40 : f32 to vector<8x128xf32>
    %130 = arith.subf %129, %123 : vector<8x128xf32>
    %131 = arith.mulf %130, %128 : vector<8x128xf32>
    %132 = arith.mulf %123, %103 : vector<8x128xf32>
    %133 = arith.addf %131, %132 : vector<8x128xf32>
    %c24_41 = arith.constant 24 : index
    %c0_42 = arith.constant 0 : index
    %134 = vector.load %arg6[%c24_41, %c0_42] : memref<64x128xf32, #tpu.memory_space<vmem>>, vector<8x128xf32>
    tpu.vector_store %arg6[%c24_41, %c0_42], %133 {strides = array<i32>} : memref<64x128xf32, #tpu.memory_space<vmem>>, vector<8x128xf32>,
    %c32 = arith.constant 32 : index
    %c0_43 = arith.constant 0 : index
    %135 = vector.load %arg8[%c32, %c0_43] : memref<64x384xf32, #tpu.memory_space<vmem>>, vector<8x384xf32>
    %cst_44 = arith.constant dense<0.000000e+00> : vector<8x384xf32>
    %136 = tpu.matmul %133, %10, %cst_44 {dimension_numbers = #tpu.dot_dimension_numbers<[1], [0], [0], [1], [0, 0, 1, 1], [], []>} : vector<8x128xf32>, vector<128x384xf32>, vector<8x384xf32> -> vector<8x384xf32>
    %137 = arith.addf %136, %13 : vector<8x384xf32>
    %138 = vector.extract_strided_slice %135 {offsets = [0, 0], sizes = [8, 128], strides = [1, 1]} : vector<8x384xf32> to vector<8x128xf32>
    %139 = vector.extract_strided_slice %137 {offsets = [0, 0], sizes = [8, 128], strides = [1, 1]} : vector<8x384xf32> to vector<8x128xf32>
    %140 = arith.addf %138, %139 : vector<8x128xf32>
    %141 = arith.negf %140 : vector<8x128xf32>
    %142 = math.exp %141 : vector<8x128xf32>
    %cst_45 = arith.constant 1.000000e+00 : f32
    %143 = vector.broadcast %cst_45 : f32 to vector<8x128xf32>
    %144 = arith.addf %143, %142 : vector<8x128xf32>
    %145 = arith.divf %143, %144 : vector<8x128xf32>
    %146 = vector.extract_strided_slice %135 {offsets = [0, 128], sizes = [8, 128], strides = [1, 1]} : vector<8x384xf32> to vector<8x128xf32>
    %147 = vector.extract_strided_slice %137 {offsets = [0, 128], sizes = [8, 128], strides = [1, 1]} : vector<8x384xf32> to vector<8x128xf32>
    %148 = arith.addf %146, %147 : vector<8x128xf32>
    %149 = arith.negf %148 : vector<8x128xf32>
    %150 = math.exp %149 : vector<8x128xf32>
    %cst_46 = arith.constant 1.000000e+00 : f32
    %151 = vector.broadcast %cst_46 : f32 to vector<8x128xf32>
    %152 = arith.addf %151, %150 : vector<8x128xf32>
    %153 = arith.divf %151, %152 : vector<8x128xf32>
    %154 = vector.extract_strided_slice %135 {offsets = [0, 256], sizes = [8, 128], strides = [1, 1]} : vector<8x384xf32> to vector<8x128xf32>
    %155 = vector.extract_strided_slice %137 {offsets = [0, 256], sizes = [8, 128], strides = [1, 1]} : vector<8x384xf32> to vector<8x128xf32>
    %156 = arith.mulf %145, %155 : vector<8x128xf32>
    %157 = arith.addf %154, %156 : vector<8x128xf32>
    %158 = math.tanh %157 : vector<8x128xf32>
    %cst_47 = arith.constant 1.000000e+00 : f32
    %159 = vector.broadcast %cst_47 : f32 to vector<8x128xf32>
    %160 = arith.subf %159, %153 : vector<8x128xf32>
    %161 = arith.mulf %160, %158 : vector<8x128xf32>
    %162 = arith.mulf %153, %133 : vector<8x128xf32>
    %163 = arith.addf %161, %162 : vector<8x128xf32>
    %c32_48 = arith.constant 32 : index
    %c0_49 = arith.constant 0 : index
    %164 = vector.load %arg6[%c32_48, %c0_49] : memref<64x128xf32, #tpu.memory_space<vmem>>, vector<8x128xf32>
    tpu.vector_store %arg6[%c32_48, %c0_49], %163 {strides = array<i32>} : memref<64x128xf32, #tpu.memory_space<vmem>>, vector<8x128xf32>,
    %c40 = arith.constant 40 : index
    %c0_50 = arith.constant 0 : index
    %165 = vector.load %arg8[%c40, %c0_50] : memref<64x384xf32, #tpu.memory_space<vmem>>, vector<8x384xf32>
    %cst_51 = arith.constant dense<0.000000e+00> : vector<8x384xf32>
    %166 = tpu.matmul %163, %10, %cst_51 {dimension_numbers = #tpu.dot_dimension_numbers<[1], [0], [0], [1], [0, 0, 1, 1], [], []>} : vector<8x128xf32>, vector<128x384xf32>, vector<8x384xf32> -> vector<8x384xf32>
    %167 = arith.addf %166, %13 : vector<8x384xf32>
    %168 = vector.extract_strided_slice %165 {offsets = [0, 0], sizes = [8, 128], strides = [1, 1]} : vector<8x384xf32> to vector<8x128xf32>
    %169 = vector.extract_strided_slice %167 {offsets = [0, 0], sizes = [8, 128], strides = [1, 1]} : vector<8x384xf32> to vector<8x128xf32>
    %170 = arith.addf %168, %169 : vector<8x128xf32>
    %171 = arith.negf %170 : vector<8x128xf32>
    %172 = math.exp %171 : vector<8x128xf32>
    %cst_52 = arith.constant 1.000000e+00 : f32
    %173 = vector.broadcast %cst_52 : f32 to vector<8x128xf32>
    %174 = arith.addf %173, %172 : vector<8x128xf32>
    %175 = arith.divf %173, %174 : vector<8x128xf32>
    %176 = vector.extract_strided_slice %165 {offsets = [0, 128], sizes = [8, 128], strides = [1, 1]} : vector<8x384xf32> to vector<8x128xf32>
    %177 = vector.extract_strided_slice %167 {offsets = [0, 128], sizes = [8, 128], strides = [1, 1]} : vector<8x384xf32> to vector<8x128xf32>
    %178 = arith.addf %176, %177 : vector<8x128xf32>
    %179 = arith.negf %178 : vector<8x128xf32>
    %180 = math.exp %179 : vector<8x128xf32>
    %cst_53 = arith.constant 1.000000e+00 : f32
    %181 = vector.broadcast %cst_53 : f32 to vector<8x128xf32>
    %182 = arith.addf %181, %180 : vector<8x128xf32>
    %183 = arith.divf %181, %182 : vector<8x128xf32>
    %184 = vector.extract_strided_slice %165 {offsets = [0, 256], sizes = [8, 128], strides = [1, 1]} : vector<8x384xf32> to vector<8x128xf32>
    %185 = vector.extract_strided_slice %167 {offsets = [0, 256], sizes = [8, 128], strides = [1, 1]} : vector<8x384xf32> to vector<8x128xf32>
    %186 = arith.mulf %175, %185 : vector<8x128xf32>
    %187 = arith.addf %184, %186 : vector<8x128xf32>
    %188 = math.tanh %187 : vector<8x128xf32>
    %cst_54 = arith.constant 1.000000e+00 : f32
    %189 = vector.broadcast %cst_54 : f32 to vector<8x128xf32>
    %190 = arith.subf %189, %183 : vector<8x128xf32>
    %191 = arith.mulf %190, %188 : vector<8x128xf32>
    %192 = arith.mulf %183, %163 : vector<8x128xf32>
    %193 = arith.addf %191, %192 : vector<8x128xf32>
    %c40_55 = arith.constant 40 : index
    %c0_56 = arith.constant 0 : index
    %194 = vector.load %arg6[%c40_55, %c0_56] : memref<64x128xf32, #tpu.memory_space<vmem>>, vector<8x128xf32>
    tpu.vector_store %arg6[%c40_55, %c0_56], %193 {strides = array<i32>} : memref<64x128xf32, #tpu.memory_space<vmem>>, vector<8x128xf32>,
    %c48 = arith.constant 48 : index
    %c0_57 = arith.constant 0 : index
    %195 = vector.load %arg8[%c48, %c0_57] : memref<64x384xf32, #tpu.memory_space<vmem>>, vector<8x384xf32>
    %cst_58 = arith.constant dense<0.000000e+00> : vector<8x384xf32>
    %196 = tpu.matmul %193, %10, %cst_58 {dimension_numbers = #tpu.dot_dimension_numbers<[1], [0], [0], [1], [0, 0, 1, 1], [], []>} : vector<8x128xf32>, vector<128x384xf32>, vector<8x384xf32> -> vector<8x384xf32>
    %197 = arith.addf %196, %13 : vector<8x384xf32>
    %198 = vector.extract_strided_slice %195 {offsets = [0, 0], sizes = [8, 128], strides = [1, 1]} : vector<8x384xf32> to vector<8x128xf32>
    %199 = vector.extract_strided_slice %197 {offsets = [0, 0], sizes = [8, 128], strides = [1, 1]} : vector<8x384xf32> to vector<8x128xf32>
    %200 = arith.addf %198, %199 : vector<8x128xf32>
    %201 = arith.negf %200 : vector<8x128xf32>
    %202 = math.exp %201 : vector<8x128xf32>
    %cst_59 = arith.constant 1.000000e+00 : f32
    %203 = vector.broadcast %cst_59 : f32 to vector<8x128xf32>
    %204 = arith.addf %203, %202 : vector<8x128xf32>
    %205 = arith.divf %203, %204 : vector<8x128xf32>
    %206 = vector.extract_strided_slice %195 {offsets = [0, 128], sizes = [8, 128], strides = [1, 1]} : vector<8x384xf32> to vector<8x128xf32>
    %207 = vector.extract_strided_slice %197 {offsets = [0, 128], sizes = [8, 128], strides = [1, 1]} : vector<8x384xf32> to vector<8x128xf32>
    %208 = arith.addf %206, %207 : vector<8x128xf32>
    %209 = arith.negf %208 : vector<8x128xf32>
    %210 = math.exp %209 : vector<8x128xf32>
    %cst_60 = arith.constant 1.000000e+00 : f32
    %211 = vector.broadcast %cst_60 : f32 to vector<8x128xf32>
    %212 = arith.addf %211, %210 : vector<8x128xf32>
    %213 = arith.divf %211, %212 : vector<8x128xf32>
    %214 = vector.extract_strided_slice %195 {offsets = [0, 256], sizes = [8, 128], strides = [1, 1]} : vector<8x384xf32> to vector<8x128xf32>
    %215 = vector.extract_strided_slice %197 {offsets = [0, 256], sizes = [8, 128], strides = [1, 1]} : vector<8x384xf32> to vector<8x128xf32>
    %216 = arith.mulf %205, %215 : vector<8x128xf32>
    %217 = arith.addf %214, %216 : vector<8x128xf32>
    %218 = math.tanh %217 : vector<8x128xf32>
    %cst_61 = arith.constant 1.000000e+00 : f32
    %219 = vector.broadcast %cst_61 : f32 to vector<8x128xf32>
    %220 = arith.subf %219, %213 : vector<8x128xf32>
    %221 = arith.mulf %220, %218 : vector<8x128xf32>
    %222 = arith.mulf %213, %193 : vector<8x128xf32>
    %223 = arith.addf %221, %222 : vector<8x128xf32>
    %c48_62 = arith.constant 48 : index
    %c0_63 = arith.constant 0 : index
    %224 = vector.load %arg6[%c48_62, %c0_63] : memref<64x128xf32, #tpu.memory_space<vmem>>, vector<8x128xf32>
    tpu.vector_store %arg6[%c48_62, %c0_63], %223 {strides = array<i32>} : memref<64x128xf32, #tpu.memory_space<vmem>>, vector<8x128xf32>,
    %c56 = arith.constant 56 : index
    %c0_64 = arith.constant 0 : index
    %225 = vector.load %arg8[%c56, %c0_64] : memref<64x384xf32, #tpu.memory_space<vmem>>, vector<8x384xf32>
    %cst_65 = arith.constant dense<0.000000e+00> : vector<8x384xf32>
    %226 = tpu.matmul %223, %10, %cst_65 {dimension_numbers = #tpu.dot_dimension_numbers<[1], [0], [0], [1], [0, 0, 1, 1], [], []>} : vector<8x128xf32>, vector<128x384xf32>, vector<8x384xf32> -> vector<8x384xf32>
    %227 = arith.addf %226, %13 : vector<8x384xf32>
    %228 = vector.extract_strided_slice %225 {offsets = [0, 0], sizes = [8, 128], strides = [1, 1]} : vector<8x384xf32> to vector<8x128xf32>
    %229 = vector.extract_strided_slice %227 {offsets = [0, 0], sizes = [8, 128], strides = [1, 1]} : vector<8x384xf32> to vector<8x128xf32>
    %230 = arith.addf %228, %229 : vector<8x128xf32>
    %231 = arith.negf %230 : vector<8x128xf32>
    %232 = math.exp %231 : vector<8x128xf32>
    %cst_66 = arith.constant 1.000000e+00 : f32
    %233 = vector.broadcast %cst_66 : f32 to vector<8x128xf32>
    %234 = arith.addf %233, %232 : vector<8x128xf32>
    %235 = arith.divf %233, %234 : vector<8x128xf32>
    %236 = vector.extract_strided_slice %225 {offsets = [0, 128], sizes = [8, 128], strides = [1, 1]} : vector<8x384xf32> to vector<8x128xf32>
    %237 = vector.extract_strided_slice %227 {offsets = [0, 128], sizes = [8, 128], strides = [1, 1]} : vector<8x384xf32> to vector<8x128xf32>
    %238 = arith.addf %236, %237 : vector<8x128xf32>
    %239 = arith.negf %238 : vector<8x128xf32>
    %240 = math.exp %239 : vector<8x128xf32>
    %cst_67 = arith.constant 1.000000e+00 : f32
    %241 = vector.broadcast %cst_67 : f32 to vector<8x128xf32>
    %242 = arith.addf %241, %240 : vector<8x128xf32>
    %243 = arith.divf %241, %242 : vector<8x128xf32>
    %244 = vector.extract_strided_slice %225 {offsets = [0, 256], sizes = [8, 128], strides = [1, 1]} : vector<8x384xf32> to vector<8x128xf32>
    %245 = vector.extract_strided_slice %227 {offsets = [0, 256], sizes = [8, 128], strides = [1, 1]} : vector<8x384xf32> to vector<8x128xf32>
    %246 = arith.mulf %235, %245 : vector<8x128xf32>
    %247 = arith.addf %244, %246 : vector<8x128xf32>
    %248 = math.tanh %247 : vector<8x128xf32>
    %cst_68 = arith.constant 1.000000e+00 : f32
    %249 = vector.broadcast %cst_68 : f32 to vector<8x128xf32>
    %250 = arith.subf %249, %243 : vector<8x128xf32>
    %251 = arith.mulf %250, %248 : vector<8x128xf32>
    %252 = arith.mulf %243, %223 : vector<8x128xf32>
    %253 = arith.addf %251, %252 : vector<8x128xf32>
    %c56_69 = arith.constant 56 : index
    %c0_70 = arith.constant 0 : index
    %254 = vector.load %arg6[%c56_69, %c0_70] : memref<64x128xf32, #tpu.memory_space<vmem>>, vector<8x128xf32>
    tpu.vector_store %arg6[%c56_69, %c0_70], %253 {strides = array<i32>} : memref<64x128xf32, #tpu.memory_space<vmem>>, vector<8x128xf32>,
    %c0_71 = arith.constant 0 : index
    %c0_72 = arith.constant 0 : index
    %255 = vector.load %arg7[%c0_71, %c0_72] : memref<8x128xf32, #tpu.memory_space<vmem>>, vector<8x128xf32>
    tpu.vector_store %arg7[%c0_71, %c0_72], %253 {strides = array<i32>} : memref<8x128xf32, #tpu.memory_space<vmem>>, vector<8x128xf32>,
    return
  }
  func.func @transform_0(%arg0: i32) -> (i32, i32) {
    %c0_i32 = arith.constant 0 : i32
    %c0_i32_0 = arith.constant 0 : i32
    return %arg0, %c0_i32 : i32, i32
  }
  func.func @transform_1(%arg0: i32) -> (i32, i32) {
    %c0_i32 = arith.constant 0 : i32
    %c0_i32_0 = arith.constant 0 : i32
    %c0_i32_1 = arith.constant 0 : i32
    return %c0_i32, %c0_i32_0 : i32, i32
  }
  func.func @transform_2(%arg0: i32) -> (i32, i32) {
    %c0_i32 = arith.constant 0 : i32
    %c0_i32_0 = arith.constant 0 : i32
    %c0_i32_1 = arith.constant 0 : i32
    return %c0_i32, %c0_i32_0 : i32, i32
  }
  func.func @transform_3(%arg0: i32) -> (i32, i32) {
    %c0_i32 = arith.constant 0 : i32
    %c0_i32_0 = arith.constant 0 : i32
    %c0_i32_1 = arith.constant 0 : i32
    return %c0_i32, %c0_i32_0 : i32, i32
  }
  func.func @transform_4(%arg0: i32) -> (i32, i32) {
    %c0_i32 = arith.constant 0 : i32
    %c0_i32_0 = arith.constant 0 : i32
    %c0_i32_1 = arith.constant 0 : i32
    return %c0_i32, %c0_i32_0 : i32, i32
  }
  func.func @transform_5(%arg0: i32) -> (i32, i32) {
    %c0_i32 = arith.constant 0 : i32
    %c0_i32_0 = arith.constant 0 : i32
    return %arg0, %c0_i32 : i32, i32
  }
}

module attributes {stable_mosaic.version = 11 : i64} {
  func.func @fc_head_kernel(%arg0: i32, %arg1: i32, %arg2: memref<64x128xf32, #tpu.memory_space<vmem>>, %arg3: memref<128x128xf32, #tpu.memory_space<vmem>>, %arg4: memref<1x128xf32, #tpu.memory_space<vmem>>, %arg5: memref<64x128xf32, #tpu.memory_space<vmem>>) attributes {dimension_semantics = [#tpu.dimension_semantics<parallel>, #tpu.dimension_semantics<parallel>], iteration_bounds = array<i64: 1, 1>, scalar_prefetch = 0 : i64, scratch_operands = 0 : i64, tpu.core_type = #tpu.core_type<tc>, window_params = [{transform_indices = @transform_0, window_bounds = array<i64: 64, 128>}, {transform_indices = @transform_1, window_bounds = array<i64: 128, 128>}, {transform_indices = @transform_2, window_bounds = array<i64: 1, 128>}, {transform_indices = @transform_3, window_bounds = array<i64: 64, 128>}]} {
    %c0 = arith.constant 0 : index
    %c0_0 = arith.constant 0 : index
    %0 = vector.load %arg2[%c0, %c0_0] : memref<64x128xf32, #tpu.memory_space<vmem>>, vector<64x128xf32>
    %c0_1 = arith.constant 0 : index
    %c0_2 = arith.constant 0 : index
    %1 = vector.load %arg3[%c0_1, %c0_2] : memref<128x128xf32, #tpu.memory_space<vmem>>, vector<128x128xf32>
    %cst = arith.constant dense<0.000000e+00> : vector<64x128xf32>
    %2 = tpu.matmul %0, %1, %cst {dimension_numbers = #tpu.dot_dimension_numbers<[1], [0], [0], [1], [0, 0, 1, 1], [], []>} : vector<64x128xf32>, vector<128x128xf32>, vector<64x128xf32> -> vector<64x128xf32>
    %c0_3 = arith.constant 0 : index
    %c0_4 = arith.constant 0 : index
    %3 = vector.load %arg4[%c0_3, %c0_4] : memref<1x128xf32, #tpu.memory_space<vmem>>, vector<1x128xf32>
    %4 = vector.broadcast %3 : vector<1x128xf32> to vector<64x128xf32>
    %5 = arith.addf %2, %4 : vector<64x128xf32>
    %c0_5 = arith.constant 0 : index
    %c0_6 = arith.constant 0 : index
    %6 = vector.load %arg5[%c0_5, %c0_6] : memref<64x128xf32, #tpu.memory_space<vmem>>, vector<64x128xf32>
    tpu.vector_store %arg5[%c0_5, %c0_6], %5 {strides = array<i32>} : memref<64x128xf32, #tpu.memory_space<vmem>>, vector<64x128xf32>,
    return
  }
  func.func @transform_0(%arg0: i32, %arg1: i32) -> (i32, i32) {
    %c0_i32 = arith.constant 0 : i32
    %c0_i32_0 = arith.constant 0 : i32
    return %arg0, %c0_i32 : i32, i32
  }
  func.func @transform_1(%arg0: i32, %arg1: i32) -> (i32, i32) {
    %c0_i32 = arith.constant 0 : i32
    %c0_i32_0 = arith.constant 0 : i32
    return %c0_i32, %arg1 : i32, i32
  }
  func.func @transform_2(%arg0: i32, %arg1: i32) -> (i32, i32) {
    %c0_i32 = arith.constant 0 : i32
    %c0_i32_0 = arith.constant 0 : i32
    return %c0_i32, %arg1 : i32, i32
  }
  func.func @transform_3(%arg0: i32, %arg1: i32) -> (i32, i32) {
    %c0_i32 = arith.constant 0 : i32
    return %arg0, %arg1 : i32, i32
  }
}

</mosaic_0001>

<bundles_post_ra>
// kernel: tamer_decoder_forward.3
= control target key start
LH: loop header
LB: loop body
LE: loop exit
PB: predicated region body
PF: predicated region fallthrough
CT: control target
= control target key end

     0   :  { %s398_s1 = inlined_call_operand.vmem [shape: f32[128,128], index: 1, kind: input, shape index: {}]   ;;  %s399_s0 = inlined_call_operand.vmem [shape: f32[64,128], index: 0, kind: input, shape index: {}]   ;;  %s400_s2 = inlined_call_operand.vmem [shape: f32[1,128], index: 2, kind: input, shape index: {}]   ;;  %s401_s3 = inlined_call_operand.vmem [shape: f32[64,128], index: 3, kind: output, shape index: {}]  }
   0x1   :  { %v22_v0 = vld [vmem:[%s398_s1] sm:$0xff]  ;;  %v23_v1 = vld [vmem:[%s398_s1 + $0x8] sm:$0xff]  ;;  %v24_v2 = vld [vmem:[%s398_s1 + $0x10] sm:$0xff] }
   0x2   :  { %v231_v3 = vpack.c.bf16 %v23_v1, %v22_v0  ;;  %v25_v4 = vld [vmem:[%s398_s1 + $0x18] sm:$0xff]  ;;  %v26_v6 = vld [vmem:[%s398_s1 + $0x20] sm:$0xff]  ;;  %v27_v7 = vld [vmem:[%s398_s1 + $0x28] sm:$0xff] }
   0x3   :  { %v235_v5 = vpack.c.bf16 %v25_v4, %v24_v2  ;;  %v239_v8 = vpack.c.bf16 %v27_v7, %v26_v6  ;;  %v14_v9 = vld [vmem:[%s399_s0] sm:$0xff]  ;;  %v28_v11 = vld [vmem:[%s398_s1 + $0x30] sm:$0xff]  ;;  %v29_v12 = vld [vmem:[%s398_s1 + $0x38] sm:$0xff] }
   0x4   :  { %232 = vmatprep.subr.bf16.mxu0 %v231_v3  ;;  %263 = vmatprep.subr.bf16.mxu1 %v231_v3  ;;  %v18_v10 = vld [vmem:[%s399_s0 + $0x20] sm:$0xff]  ;;  %v243_v13 = vpack.c.bf16 %v29_v12, %v28_v11  ;;  %v31_v15 = vld [vmem:[%s398_s1 + $0x48] sm:$0xff]  ;;  %v32_v17 = vld [vmem:[%s398_s1 + $0x50] sm:$0xff] }
   0x5   :  { %234 = vmatpush3.bf16.msra.mxu0 %v231_v3  ;;  %271 = vmatpush3.bf16.msra.mxu1 %v231_v3  ;;  %v30_v14 = vld [vmem:[%s398_s1 + $0x40] sm:$0xff]  ;;  %v33_v18 = vld [vmem:[%s398_s1 + $0x58] sm:$0xff]  ;;  %v35_v21 = vld [vmem:[%s398_s1 + $0x68] sm:$0xff] }
   0x6   :  { %236 = vmatprep.subr.bf16.mxu0 %v235_v5  ;;  %264 = vmatprep.subr.bf16.mxu1 %v235_v5  ;;  %v247_v16 = vpack.c.bf16 %v31_v15, %v30_v14  ;;  %v251_v19 = vpack.c.bf16 %v33_v18, %v32_v17  ;;  %v34_v20 = vld [vmem:[%s398_s1 + $0x60] sm:$0xff]  ;;  %v36_v23 = vld [vmem:[%s398_s1 + $0x70] sm:$0xff]  ;;  %v37_v24 = vld [vmem:[%s398_s1 + $0x78] sm:$0xff] }
   0x7   :  { %219 = vmatprep.mubr.f32.mxu0 %v14_v9  ;;  %225 = vmatprep.mubr.f32.mxu1 %v18_v10  ;;  %v255_v22 = vpack.c.bf16 %v35_v21, %v34_v20  ;;  %v259_v25 = vpack.c.bf16 %v37_v24, %v36_v23  ;;  %v15_v26 = vld [vmem:[%s399_s0 + $0x8] sm:$0xff]  ;;  %v16_v28 = vld [vmem:[%s399_s0 + $0x10] sm:$0xff]  ;;  %v17_v30 = vld [vmem:[%s399_s0 + $0x18] sm:$0xff] }
   0x8   :  { %v19_v27 = vld [vmem:[%s399_s0 + $0x28] sm:$0xff]  ;;  %v20_v29 = vld [vmem:[%s399_s0 + $0x30] sm:$0xff]  ;;  %v21_v31 = vld [vmem:[%s399_s0 + $0x38] sm:$0xff] }
   0x9   :  { %238 = vmatpush3.bf16.msra.mxu0 %v235_v5  ;;  %272 = vmatpush3.bf16.msra.mxu1 %v235_v5  ;;  %v162_v32 = vld [vmem:[%s400_s2] ss:$0 sm:$0xff] }
   0xa   :  { %240 = vmatprep.subr.bf16.mxu0 %v239_v8  ;;  %265 = vmatprep.subr.bf16.mxu1 %v239_v8 }
   0xd   :  { %242 = vmatpush3.bf16.msra.mxu0 %v239_v8  ;;  %273 = vmatpush3.bf16.msra.mxu1 %v239_v8 }
   0xe   :  { %244 = vmatprep.subr.bf16.mxu0 %v243_v13  ;;  %266 = vmatprep.subr.bf16.mxu1 %v243_v13 }
  0x11   :  { %246 = vmatpush3.bf16.msra.mxu0 %v243_v13  ;;  %274 = vmatpush3.bf16.msra.mxu1 %v243_v13 }
  0x12   :  { %248 = vmatprep.subr.bf16.mxu0 %v247_v16  ;;  %267 = vmatprep.subr.bf16.mxu1 %v247_v16 }
  0x15   :  { %250 = vmatpush3.bf16.msra.mxu0 %v247_v16  ;;  %275 = vmatpush3.bf16.msra.mxu1 %v247_v16 }
  0x16   :  { %252 = vmatprep.subr.bf16.mxu0 %v251_v19  ;;  %268 = vmatprep.subr.bf16.mxu1 %v251_v19 }
  0x19   :  { %254 = vmatpush3.bf16.msra.mxu0 %v251_v19  ;;  %276 = vmatpush3.bf16.msra.mxu1 %v251_v19 }
  0x1a   :  { %256 = vmatprep.subr.bf16.mxu0 %v255_v22  ;;  %269 = vmatprep.subr.bf16.mxu1 %v255_v22 }
  0x1d   :  { %258 = vmatpush3.bf16.msra.mxu0 %v255_v22  ;;  %277 = vmatpush3.bf16.msra.mxu1 %v255_v22 }
  0x1e   :  { %260 = vmatprep.subr.bf16.mxu0 %v259_v25  ;;  %270 = vmatprep.subr.bf16.mxu1 %v259_v25 }
  0x21   :  { %262 = vmatpush3.bf16.msra.mxu0 %v259_v25  ;;  %278 = vmatpush3.bf16.msra.mxu1 %v259_v25 }
  0x24   :  { %220 = vmatmul.mubr.f32.vlgmr.msra.gmra.mrb[0].mxu0 %v15_v26  ;;  %226 = vmatmul.mubr.f32.vlgmr.msra.gmra.mrb[0].mxu1 %v19_v27 }
  0x25   :  { %222 = vmatprep.mubr.f32.mxu0 %v16_v28  ;;  %228 = vmatprep.mubr.f32.mxu1 %v20_v29 }
  0x28   :  { %223 = vmatmul.mubr.f32.gmra.mrb[2].mxu0 %v17_v30  ;;  %229 = vmatmul.mubr.f32.gmra.mrb[2].mxu1 %v21_v31 }
  0xf7   :  { %v221_v33 = vpop.f32.mrb[0].mxu0  ;;  %v227_v34 = vpop.f32.mrb[0].mxu1 }
  0xf8   :  { %v117_v35 = vadd.f32 %v221_v33, %v162_v32  ;;  %v137_v36 = vadd.f32 %v227_v34, %v162_v32  ;;  %v111_v37 = vpop.f32.mrb[1].mxu0  ;;  %v131_v38 = vpop.f32.mrb[1].mxu1 }
  0xf9   :  { %v112_v39 = vadd.f32 %v162_v32, %v111_v37  ;;  %v132_v40 = vadd.f32 %v162_v32, %v131_v38 }
  0xfa   :  { %151 = vst [vmem:[%s401_s3 + $0x8] sm:$0xff] %v117_v35  ;;  %155 = vst [vmem:[%s401_s3 + $0x28] sm:$0xff] %v137_v36 }
  0xfb   :  { %150 = vst [vmem:[%s401_s3] sm:$0xff] %v112_v39  ;;  %154 = vst [vmem:[%s401_s3 + $0x20] sm:$0xff] %v132_v40  ;;  %v224_v41 = vpop.f32.mrb[2].mxu0  ;;  %v230_v42 = vpop.f32.mrb[2].mxu1 }
  0xfc   :  { %v127_v43 = vadd.f32 %v224_v41, %v162_v32  ;;  %v147_v44 = vadd.f32 %v230_v42, %v162_v32  ;;  %v121_v45 = vpop.f32.mrb[3].mxu0  ;;  %v141_v46 = vpop.f32.mrb[3].mxu1 }
  0xfd   :  { %v122_v47 = vadd.f32 %v162_v32, %v121_v45  ;;  %v142_v48 = vadd.f32 %v162_v32, %v141_v46 }
  0xfe   :  { %153 = vst [vmem:[%s401_s3 + $0x18] sm:$0xff] %v127_v43  ;;  %157 = vst [vmem:[%s401_s3 + $0x38] sm:$0xff] %v147_v44 }
  0xff   :  { %152 = vst [vmem:[%s401_s3 + $0x10] sm:$0xff] %v122_v47  ;;  %156 = vst [vmem:[%s401_s3 + $0x30] sm:$0xff] %v142_v48 }

// kernel: tamer_decoder_forward.2
= control target key start
LH: loop header
LB: loop body
LE: loop exit
PB: predicated region body
PF: predicated region fallthrough
CT: control target
= control target key end

     0   :  { %v2882_v3 = vmov 0.0   ;;  %vm2884_vm0 = vmmov 0   ;;  %s3680_s1 = inlined_call_operand.vmem [shape: f32[128,384], index: 1, kind: input, shape index: {}]   ;;  %s3681_s0 = inlined_call_operand.vmem [shape: f32[64,128], index: 0, kind: input, shape index: {}]   ;;  %s3682_s2 = inlined_call_operand.vmem [shape: f32[128,384], index: 2, kind: input, shape index: {}]   ;;  %s3683_s3 = inlined_call_operand.vmem [shape: f32[1,384], index: 3, kind: input, shape index: {}]   ;;  %s3684_s4 = inlined_call_operand.vmem [shape: f32[1,384], index: 4, kind: input, shape index: {}]   ;;  %s3685_s5 = inlined_call_operand.vmem [shape: f32[64,128], index: 5, kind: output, shape index: {}]  }
   0x1   :  { %v34_v0 = vld [vmem:[%s3680_s1 + $0x8] sm:$0xff]  ;;  %v37_v1 = vld [vmem:[%s3680_s1 + $0x20] sm:$0xff]  ;;  %162 = vmatprep.mubr.f32.mxu0 %v2882_v3  ;;  %v36_v5 = vld [vmem:[%s3680_s1 + $0x18] sm:$0xff] }
   0x2   :  { %v33_v2 = vld [vmem:[%s3680_s1] sm:$0xff]  ;;  %v2239_v4 = vpack.c.bf16 %v37_v1, %v34_v0  ;;  %v40_v6 = vld [vmem:[%s3680_s1 + $0x38] sm:$0xff]  ;;  %v43_v7 = vld [vmem:[%s3680_s1 + $0x50] sm:$0xff] }
   0x3   :  { %v2241_v8 = vpack.c.bf16 %v36_v5, %v33_v2  ;;  %v2243_v9 = vpack.c.bf16 %v43_v7, %v40_v6  ;;  %v39_v10 = vld [vmem:[%s3680_s1 + $0x30] sm:$0xff]  ;;  %v42_v11 = vld [vmem:[%s3680_s1 + $0x48] sm:$0xff]  ;;  %v49_v13 = vld [vmem:[%s3680_s1 + $0x80] sm:$0xff] }
   0x4   :  { %v46_v12 = vld [vmem:[%s3680_s1 + $0x68] sm:$0xff]  ;;  %2240 = vmatprep.subr.bf16.mxu0 %v2239_v4  ;;  %v2245_v14 = vpack.c.bf16 %v42_v11, %v39_v10  ;;  %v45_v16 = vld [vmem:[%s3680_s1 + $0x60] sm:$0xff]  ;;  %v48_v17 = vld [vmem:[%s3680_s1 + $0x78] sm:$0xff] }
   0x5   :  { %2242 = vmatpush1.bf16.msra.mxu0 %v2241_v8  ;;  %v2247_v15 = vpack.c.bf16 %v49_v13, %v46_v12  ;;  %v52_v18 = vld [vmem:[%s3680_s1 + $0x98] sm:$0xff]  ;;  %v55_v19 = vld [vmem:[%s3680_s1 + $0xb0] sm:$0xff]  ;;  %v2249_v20 = vpack.c.bf16 %v48_v17, %v45_v16  ;;  %v54_v23 = vld [vmem:[%s3680_s1 + $0xa8] sm:$0xff] }
   0x6   :  { %2244 = vmatprep.subr.bf16.mxu0 %v2243_v9  ;;  %v51_v21 = vld [vmem:[%s3680_s1 + $0x90] sm:$0xff]  ;;  %v2251_v22 = vpack.c.bf16 %v55_v19, %v52_v18  ;;  %v38_v25 = vld [vmem:[%s3680_s1 + $0x28] sm:$0xff]  ;;  %v61_v27 = vld [vmem:[%s3680_s1 + $0xe0] sm:$0xff] }
   0x7   :  { %v35_v24 = vld [vmem:[%s3680_s1 + $0x10] sm:$0xff]  ;;  %v58_v26 = vld [vmem:[%s3680_s1 + $0xc8] sm:$0xff]  ;;  %v41_v29 = vld [vmem:[%s3680_s1 + $0x40] sm:$0xff]  ;;  %v2253_v31 = vpack.c.bf16 %v54_v23, %v51_v21 }
   0x8   :  { %v2271_v28 = vpack.c.bf16 %v38_v25, %v35_v24  ;;  %v44_v30 = vld [vmem:[%s3680_s1 + $0x58] sm:$0xff]  ;;  %v57_v32 = vld [vmem:[%s3680_s1 + $0xc0] sm:$0xff]  ;;  %v2255_v34 = vpack.c.bf16 %v61_v27, %v58_v26  ;;  %v47_v37 = vld [vmem:[%s3680_s1 + $0x70] sm:$0xff] }
   0x9   :  { %2246 = vmatpush1.bf16.msra.mxu0 %v2245_v14  ;;  %v2275_v33 = vpack.c.bf16 %v44_v30, %v41_v29  ;;  %v60_v35 = vld [vmem:[%s3680_s1 + $0xd8] sm:$0xff]  ;;  %v2991_v36 = vld [vmem:[%s3681_s0] sm:$0xff]  ;;  %v67_v39 = vld [vmem:[%s3680_s1 + $0x110] sm:$0xff] }
   0xa   :  { %2248 = vmatprep.subr.bf16.mxu0 %v2247_v15  ;;  %2272 = vmatprep.subr.bf16.mxu1 %v2271_v28  ;;  %v64_v38 = vld [vmem:[%s3680_s1 + $0xf8] sm:$0xff]  ;;  %v50_v40 = vld [vmem:[%s3680_s1 + $0x88] sm:$0xff]  ;;  %v2257_v42 = vpack.c.bf16 %v60_v35, %v57_v32  ;;  %v53_v43 = vld [vmem:[%s3680_s1 + $0xa0] sm:$0xff] }
   0xb   :  { %2274 = vmatpush3.bf16.msra.mxu1 %v2271_v28  ;;  %1947 = vmatprep.mubr.f32.mxu1 %v2991_v36  ;;  %v2279_v41 = vpack.c.bf16 %v50_v40, %v47_v37  ;;  %v56_v44 = vld [vmem:[%s3680_s1 + $0xb8] sm:$0xff]  ;;  %v2259_v45 = vpack.c.bf16 %v67_v39, %v64_v38  ;;  %v63_v46 = vld [vmem:[%s3680_s1 + $0xf0] sm:$0xff]  ;;  %v66_v47 = vld [vmem:[%s3680_s1 + $0x108] sm:$0xff]  ;;  %v2883_v40 = vmov 0.0|0.0  }
   0xc   :  { %2276 = vmatprep.subr.bf16.mxu1 %v2275_v33  ;;  %v70_v48 = vld [vmem:[%s3680_s1 + $0x128] sm:$0xff]  ;;  %v73_v49 = vld [vmem:[%s3680_s1 + $0x140] sm:$0xff]  ;;  %v2283_v50 = vpack.c.bf16 %v56_v44, %v53_v43  ;;  %v59_v51 = vld [vmem:[%s3680_s1 + $0xd0] sm:$0xff]  ;;  %v2261_v53 = vpack.c.bf16 %v66_v47, %v63_v46 }
   0xd   :  { %2250 = vmatpush1.bf16.msra.mxu0 %v2249_v20  ;;  %v62_v52 = vld [vmem:[%s3680_s1 + $0xe8] sm:$0xff]  ;;  %v2263_v54 = vpack.c.bf16 %v73_v49, %v70_v48  ;;  %v69_v55 = vld [vmem:[%s3680_s1 + $0x120] sm:$0xff]  ;;  %v72_v56 = vld [vmem:[%s3680_s1 + $0x138] sm:$0xff] }
   0xe   :  { %2252 = vmatprep.subr.bf16.mxu0 %v2251_v22  ;;  %v76_v57 = vld [vmem:[%s3680_s1 + $0x158] sm:$0xff]  ;;  %v79_v58 = vld [vmem:[%s3680_s1 + $0x170] sm:$0xff]  ;;  %v2287_v59 = vpack.c.bf16 %v62_v52, %v59_v51  ;;  %v65_v60 = vld [vmem:[%s3680_s1 + $0x100] sm:$0xff]  ;;  %v2265_v62 = vpack.c.bf16 %v72_v56, %v69_v55 }
   0xf   :  { %2278 = vmatpush3.bf16.msra.mxu1 %v2275_v33  ;;  %v68_v61 = vld [vmem:[%s3680_s1 + $0x118] sm:$0xff]  ;;  %v2267_v63 = vpack.c.bf16 %v79_v58, %v76_v57  ;;  %v75_v0 = vld [vmem:[%s3680_s1 + $0x150] sm:$0xff]  ;;  %v78_v1 = vld [vmem:[%s3680_s1 + $0x168] sm:$0xff] }
  0x10   :  { %2280 = vmatprep.subr.bf16.mxu1 %v2279_v41  ;;  %v341_v2 = vld [vmem:[%s3682_s2 + $0x8] sm:$0xff]  ;;  %v344_v4 = vld [vmem:[%s3682_s2 + $0x20] sm:$0xff]  ;;  %v2291_v5 = vpack.c.bf16 %v68_v61, %v65_v60  ;;  %v71_v6 = vld [vmem:[%s3680_s1 + $0x130] sm:$0xff]  ;;  %v2269_v8 = vpack.c.bf16 %v78_v1, %v75_v0 }
  0x11   :  { %2254 = vmatpush1.bf16.msra.mxu0 %v2253_v31  ;;  %v74_v7 = vld [vmem:[%s3680_s1 + $0x148] sm:$0xff]  ;;  %v3066_v9 = vpack.c.bf16 %v344_v4, %v341_v2  ;;  %v340_v10 = vld [vmem:[%s3682_s2] sm:$0xff]  ;;  %v343_v11 = vld [vmem:[%s3682_s2 + $0x18] sm:$0xff] }
  0x12   :  { %2256 = vmatprep.subr.bf16.mxu0 %v2255_v34  ;;  %v347_v12 = vld [vmem:[%s3682_s2 + $0x38] sm:$0xff]  ;;  %v350_v13 = vld [vmem:[%s3682_s2 + $0x50] sm:$0xff]  ;;  %v2295_v14 = vpack.c.bf16 %v74_v7, %v71_v6  ;;  %v77_v15 = vld [vmem:[%s3680_s1 + $0x160] sm:$0xff]  ;;  %v3086_v17 = vpack.c.bf16 %v343_v11, %v340_v10 }
  0x13   :  { %2282 = vmatpush3.bf16.msra.mxu1 %v2279_v41  ;;  %v80_v16 = vld [vmem:[%s3680_s1 + $0x178] sm:$0xff]  ;;  %v3089_v18 = vpack.c.bf16 %v350_v13, %v347_v12  ;;  %v346_v19 = vld [vmem:[%s3682_s2 + $0x30] sm:$0xff]  ;;  %v349_v20 = vld [vmem:[%s3682_s2 + $0x48] sm:$0xff] }
  0x14   :  { %2284 = vmatprep.subr.bf16.mxu1 %v2283_v50  ;;  %v353_v21 = vld [vmem:[%s3682_s2 + $0x68] sm:$0xff]  ;;  %v356_v22 = vld [vmem:[%s3682_s2 + $0x80] sm:$0xff]  ;;  %v2299_v23 = vpack.c.bf16 %v80_v16, %v77_v15  ;;  %v3109_v25 = vpack.c.bf16 %v349_v20, %v346_v19  ;;  %v355_v28 = vld [vmem:[%s3682_s2 + $0x78] sm:$0xff] }
  0x15   :  { %2258 = vmatpush1.bf16.msra.mxu0 %v2257_v42  ;;  %v26_v24 = vld [vmem:[%s3681_s0 + $0x8] sm:$0xff]  ;;  %v3112_v26 = vpack.c.bf16 %v356_v22, %v353_v21  ;;  %v352_v27 = vld [vmem:[%s3682_s2 + $0x60] sm:$0xff]  ;;  %v359_v29 = vld [vmem:[%s3682_s2 + $0x98] sm:$0xff] }
  0x16   :  { %2260 = vmatprep.subr.bf16.mxu0 %v2259_v45  ;;  %v362_v30 = vld [vmem:[%s3682_s2 + $0xb0] sm:$0xff]  ;;  %v345_v32 = vld [vmem:[%s3682_s2 + $0x28] sm:$0xff]  ;;  %v3137_v34 = vpack.c.bf16 %v355_v28, %v352_v27  ;;  %v368_v39 = vld [vmem:[%s3682_s2 + $0xe0] sm:$0xff] }
  0x17   :  { %2286 = vmatpush3.bf16.msra.mxu1 %v2283_v50  ;;  %v342_v31 = vld [vmem:[%s3682_s2 + $0x10] sm:$0xff]  ;;  %v3140_v35 = vpack.c.bf16 %v362_v30, %v359_v29  ;;  %v361_v37 = vld [vmem:[%s3682_s2 + $0xa8] sm:$0xff]  ;;  %v348_v42 = vld [vmem:[%s3682_s2 + $0x40] sm:$0xff] }
  0x18   :  { %2288 = vmatprep.subr.bf16.mxu1 %v2287_v59  ;;  %v27_v33 = vld [vmem:[%s3681_s0 + $0x10] sm:$0xff]  ;;  %v365_v38 = vld [vmem:[%s3682_s2 + $0xc8] sm:$0xff]  ;;  %v3155_v41 = vpack.c.bf16 %v345_v32, %v342_v31  ;;  %v351_v43 = vld [vmem:[%s3682_s2 + $0x58] sm:$0xff] }
  0x19   :  { %2262 = vmatpush1.bf16.msra.mxu0 %v2261_v53  ;;  %v28_v44 = vld [vmem:[%s3681_s0 + $0x18] sm:$0xff]  ;;  %v3171_v46 = vpack.c.bf16 %v368_v39, %v365_v38  ;;  %v364_v47 = vld [vmem:[%s3682_s2 + $0xc0] sm:$0xff]  ;;  %v374_v50 = vld [vmem:[%s3682_s2 + $0x110] sm:$0xff]  ;;  %v3186_v51 = vpack.c.bf16 %v351_v43, %v348_v42 }
  0x1a   :  { %2264 = vmatprep.subr.bf16.mxu0 %v2263_v54  ;;  %v367_v48 = vld [vmem:[%s3682_s2 + $0xd8] sm:$0xff]  ;;  %v354_v52 = vld [vmem:[%s3682_s2 + $0x70] sm:$0xff]  ;;  %v357_v53 = vld [vmem:[%s3682_s2 + $0x88] sm:$0xff] }
  0x1b   :  { %2290 = vmatpush3.bf16.msra.mxu1 %v2287_v59  ;;  %v371_v49 = vld [vmem:[%s3682_s2 + $0xf8] sm:$0xff]  ;;  %v29_v54 = vld [vmem:[%s3681_s0 + $0x20] sm:$0xff]  ;;  %v3200_v55 = vpack.c.bf16 %v367_v48, %v364_v47  ;;  %v370_v57 = vld [vmem:[%s3682_s2 + $0xf0] sm:$0xff]  ;;  %v3218_v61 = vpack.c.bf16 %v357_v53, %v354_v52 }
  0x1c   :  { %2292 = vmatprep.subr.bf16.mxu1 %v2291_v5  ;;  %v3203_v56 = vpack.c.bf16 %v374_v50, %v371_v49  ;;  %v373_v58 = vld [vmem:[%s3682_s2 + $0x108] sm:$0xff]  ;;  %v380_v60 = vld [vmem:[%s3682_s2 + $0x140] sm:$0xff]  ;;  %v31_v2 = vld [vmem:[%s3681_s0 + $0x30] sm:$0xff] }
  0x1d   :  { %2266 = vmatpush1.bf16.msra.mxu0 %v2265_v62  ;;  %v377_v59 = vld [vmem:[%s3682_s2 + $0x128] sm:$0xff]  ;;  %v360_v62 = vld [vmem:[%s3682_s2 + $0xa0] sm:$0xff]  ;;  %v3232_v1 = vpack.c.bf16 %v373_v58, %v370_v57  ;;  %v379_v6 = vld [vmem:[%s3682_s2 + $0x138] sm:$0xff] }
  0x1e   :  { %2268 = vmatprep.subr.bf16.mxu0 %v2267_v63  ;;  %v363_v63 = vld [vmem:[%s3682_s2 + $0xb8] sm:$0xff]  ;;  %v30_v0 = vld [vmem:[%s3681_s0 + $0x28] sm:$0xff]  ;;  %v3238_v4 = vpack.c.bf16 %v380_v60, %v377_v59  ;;  %v366_v11 = vld [vmem:[%s3682_s2 + $0xd0] sm:$0xff] }
  0x1f   :  { %2294 = vmatpush3.bf16.msra.mxu1 %v2291_v5  ;;  %v376_v5 = vld [vmem:[%s3682_s2 + $0x120] sm:$0xff]  ;;  %v383_v7 = vld [vmem:[%s3682_s2 + $0x158] sm:$0xff]  ;;  %v3253_v10 = vpack.c.bf16 %v363_v63, %v360_v62  ;;  %v369_v12 = vld [vmem:[%s3682_s2 + $0xe8] sm:$0xff] }
  0x20   :  { %2296 = vmatprep.subr.bf16.mxu1 %v2295_v14  ;;  %v3264_v13 = vpack.c.bf16 %v379_v6, %v376_v5  ;;  %v382_v16 = vld [vmem:[%s3682_s2 + $0x150] sm:$0xff]  ;;  %v385_v19 = vld [vmem:[%s3682_s2 + $0x168] sm:$0xff]  ;;  %v3279_v20 = vpack.c.bf16 %v369_v12, %v366_v11  ;;  %v372_v21 = vld [vmem:[%s3682_s2 + $0x100] sm:$0xff] }
  0x21   :  { %2270 = vmatpush1.bf16.msra.mxu0 %v2269_v8  ;;  %v386_v8 = vld [vmem:[%s3682_s2 + $0x170] sm:$0xff]  ;;  %v375_v22 = vld [vmem:[%s3682_s2 + $0x118] sm:$0xff]  ;;  %v381_v28 = vld [vmem:[%s3682_s2 + $0x148] sm:$0xff] }
  0x22   :  { %2304 = vmatprep.subr.bf16.mxu0 %v3066_v9  ;;  %v3270_v15 = vpack.c.bf16 %v386_v8, %v383_v7  ;;  %v378_v27 = vld [vmem:[%s3682_s2 + $0x130] sm:$0xff]  ;;  %v384_v30 = vld [vmem:[%s3682_s2 + $0x160] sm:$0xff]  ;;  %v387_v31 = vld [vmem:[%s3682_s2 + $0x178] sm:$0xff] }
  0x23   :  { %2298 = vmatpush3.bf16.msra.mxu1 %v2295_v14  ;;  %v32_v14 = vld [vmem:[%s3681_s0 + $0x38] sm:$0xff]  ;;  %v3309_v29 = vpack.c.bf16 %v381_v28, %v378_v27  ;;  %v3323_v32 = vpack.c.bf16 %v387_v31, %v384_v30  ;;  %v81_v38 = vld [vmem:[%s3683_s3] sm:$0x7] }
  0x24   :  { %163 = vmatmul.mubr.f32.vlgmr.msra.gmra.mrb[0].mxu0 %v2991_v36  ;;  %2300 = vmatprep.subr.bf16.mxu1 %v2299_v23  ;;  %v358_v36 = vld [vmem:[%s3682_s2 + $0x90] sm:$0xff]  ;;  %v388_v59 = vld [vmem:[%s3684_s4] sm:$0x7] }
  0x25   :  { %2306 = vmatpush1.bf16.msra.mxu0 %v3086_v17  ;;  %168 = vmatprep.mubr.f32.mxu0 %v2882_v3  ;;  %v3168_v45 = vpack.c.bf16 %v361_v37, %v358_v36 }
  0x26   :  { %2308 = vmatprep.subr.bf16.mxu0 %v3089_v18 }
  0x27   :  { %2302 = vmatpush3.bf16.msra.mxu1 %v2299_v23  ;;  %v3292_v23 = vpack.c.bf16 %v385_v19, %v382_v16 }
  0x28   :  { %169 = vmatmul.mubr.f32.gmra.mrb[2].mxu0 %v26_v24  ;;  %2335 = vmatprep.subr.bf16.mxu1 %v2883_v40 }
  0x29   :  { %2310 = vmatpush1.bf16.msra.mxu0 %v3109_v25  ;;  %174 = vmatprep.mubr.f32.mxu0 %v2882_v3 }
  0x2a   :  { %2312 = vmatprep.subr.bf16.mxu0 %v3112_v26  ;;  %1948 = vmatmul.mubr.f32.vlgmr.msra.gmra.mrb[0].mxu1 %v26_v24  ;;  %v3296_v24 = vpack.c.bf16 %v375_v22, %v372_v21 }
  0x2b   :  { %2337 = vmatpush3.bf16.msra.mxu1 %v3155_v41  ;;  %1950 = vmatprep.mubr.f32.mxu1 %v27_v33 }
  0x2c   :  { %175 = vmatmul.mubr.f32.gmra.mrb[4].mxu0 %v27_v33  ;;  %2338 = vmatprep.subr.bf16.mxu1 %v2883_v40  ;;  %v83_v33 = vlaneseq }
  0x2d   :  { %2314 = vmatpush1.bf16.msra.mxu0 %v3137_v34  ;;  %180 = vmatprep.mubr.f32.mxu0 %v2882_v3 }
  0x2e   :  { %2316 = vmatprep.subr.bf16.mxu0 %v3140_v35  ;;  %1951 = vmatmul.mubr.f32.gmra.mrb[2].mxu1 %v28_v44  ;;  %v84_v36 = vshrl.u32 %v83_v33, 7 }
  0x2f   :  { %2340 = vmatpush3.bf16.msra.mxu1 %v3186_v51  ;;  %1953 = vmatprep.mubr.f32.mxu1 %v29_v54 }
  0x30   :  { %181 = vmatmul.mubr.f32.gmra.mrb[6].mxu0 %v28_v44  ;;  %2341 = vmatprep.subr.bf16.mxu1 %v2883_v40  ;;  %v93_v37 = vsub.s32 2, %v84_v36  ;;  %v85_v58 = vsub.s32 0, %v84_v36 }
  0x31   :  { %2318 = vmatpush1.bf16.msra.mxu0 %v3168_v45  ;;  %186 = vmatprep.mubr.f32.mxu0 %v2882_v3 }
  0x32   :  { %2320 = vmatprep.subr.bf16.mxu0 %v3171_v46  ;;  %1954 = vmatmul.mubr.f32.gmra.mrb[4].mxu1 %v30_v0  ;;  %v94_v39 = vrot.slane %v81_v38, %v93_v37  ;;  %v86_v5 = vrot.slane %v81_v38, %v85_v58  ;;  %v393_v6 = vrot.slane %v388_v59, %v85_v58 }
  0x33   :  { %2343 = vmatpush3.bf16.msra.mxu1 %v3218_v61  ;;  %1956 = vmatprep.mubr.f32.mxu1 %v31_v2 }
  0x34   :  { %187 = vmatmul.mubr.f32.gmra.mrb[8].mxu0 %v29_v54  ;;  %2344 = vmatprep.subr.bf16.mxu1 %v2883_v40  ;;  %v3381_v11 = vadd.f32 %v393_v6, %v86_v5 }
  0x35   :  { %2322 = vmatpush1.bf16.msra.mxu0 %v3200_v55  ;;  %192 = vmatprep.mubr.f32.mxu0 %v2882_v3 }
  0x36   :  { %2324 = vmatprep.subr.bf16.mxu0 %v3203_v56  ;;  %1957 = vmatmul.mubr.f32.gmra.mrb[6].mxu1 %v32_v14 }
  0x37   :  { %2346 = vmatpush3.bf16.msra.mxu1 %v3253_v10  ;;  %1991 = vmatprep.mubr.msk.f32.mxu1 %vm2884_vm0, %v2882_v3 }
  0x38   :  { %193 = vmatmul.mubr.f32.gmra.mrb[10].mxu0 %v30_v0  ;;  %2347 = vmatprep.subr.bf16.mxu1 %v2883_v40  ;;  %v89_v0 = vsub.s32 1, %v84_v36  ;;  %v3387_v36 = vrot.slane %v388_v59, %v93_v37 }
  0x39   :  { %2326 = vmatpush1.bf16.msra.mxu0 %v3232_v1  ;;  %198 = vmatprep.mubr.f32.mxu0 %v2882_v3 }
  0x3a   :  { %2328 = vmatprep.subr.bf16.mxu0 %v3238_v4  ;;  %v90_v7 = vrot.slane %v81_v38, %v89_v0  ;;  %v397_v8 = vrot.slane %v388_v59, %v89_v0 }
  0x3b   :  { %2349 = vmatpush3.bf16.msra.mxu1 %v3279_v20 }
  0x3c   :  { %199 = vmatmul.mubr.f32.gmra.mrb[12].mxu0 %v31_v2  ;;  %2350 = vmatprep.subr.bf16.mxu1 %v2883_v40 }
  0x3d   :  { %2330 = vmatpush1.bf16.msra.mxu0 %v3264_v13  ;;  %204 = vmatprep.mubr.f32.mxu0 %v2882_v3 }
  0x3e   :  { %2332 = vmatprep.subr.bf16.mxu0 %v3270_v15 }
  0x3f   :  { %2352 = vmatpush3.bf16.msra.mxu1 %v3296_v24 }
  0x40   :  { %205 = vmatmul.mubr.f32.gmra.mrb[14].mxu0 %v32_v14  ;;  %2353 = vmatprep.subr.bf16.mxu1 %v2883_v40  ;;  %v3383_v14 = vadd.f32 %v397_v8, %v90_v7 }
  0x41   :  { %2334 = vmatpush1.bf16.msra.mxu0 %v3292_v23  ;;  %473 = vmatprep.mubr.f32.mxu0 %v2882_v3 }
  0x42   :  { %2360 = vmatprep.subr.bf16.mxu0 %v3066_v9 }
  0x43   :  { %2355 = vmatpush3.bf16.msra.mxu1 %v3309_v29 }
  0x44   :  { %474 = vmatmul.mubr.f32.vlgmr.msra.gmra.mrb[0].mxu0 %v2882_v3  ;;  %2356 = vmatprep.subr.bf16.mxu1 %v2883_v40 }
  0x45   :  { %2362 = vmatpush1.bf16.msra.mxu0 %v3086_v17  ;;  %639 = vmatprep.mubr.f32.mxu0 %v2882_v3 }
  0x46   :  { %2364 = vmatprep.subr.bf16.mxu0 %v3089_v18 }
  0x47   :  { %2358 = vmatpush3.bf16.msra.mxu1 %v3323_v32 }
  0x48   :  { %2391 = vmatprep.subr.bf16.mxu1 %v2883_v40 }
  0x49   :  { %2366 = vmatpush1.bf16.msra.mxu0 %v3109_v25 }
  0x4a   :  { %2368 = vmatprep.subr.bf16.mxu0 %v3112_v26  ;;  %1992 = vmatmul.mubr.f32.vlgmr.msra.gmra.mrb[8].mxu1 %v2882_v3 }
  0x4b   :  { %2393 = vmatpush3.bf16.msra.mxu1 %v3155_v41  ;;  %2026 = vmatprep.mubr.msk.f32.mxu1 %vm2884_vm0, %v2882_v3 }
  0x4c   :  { %2394 = vmatprep.subr.bf16.mxu1 %v2883_v40 }
  0x4d   :  { %2370 = vmatpush1.bf16.msra.mxu0 %v3137_v34 }
  0x4e   :  { %2372 = vmatprep.subr.bf16.mxu0 %v3140_v35 }
  0x4f   :  { %2396 = vmatpush3.bf16.msra.mxu1 %v3186_v51 }
  0x50   :  { %2397 = vmatprep.subr.bf16.mxu1 %v2883_v40 }
  0x51   :  { %2374 = vmatpush1.bf16.msra.mxu0 %v3168_v45 }
  0x52   :  { %2376 = vmatprep.subr.bf16.mxu0 %v3171_v46 }
  0x53   :  { %2399 = vmatpush3.bf16.msra.mxu1 %v3218_v61 }
  0x54   :  { %2400 = vmatprep.subr.bf16.mxu1 %v2883_v40 }
  0x55   :  { %2378 = vmatpush1.bf16.msra.mxu0 %v3200_v55 }
  0x56   :  { %2380 = vmatprep.subr.bf16.mxu0 %v3203_v56 }
  0x57   :  { %2402 = vmatpush3.bf16.msra.mxu1 %v3253_v10 }
  0x58   :  { %2403 = vmatprep.subr.bf16.mxu1 %v2883_v40 }
  0x59   :  { %2382 = vmatpush1.bf16.msra.mxu0 %v3232_v1 }
  0x5a   :  { %2384 = vmatprep.subr.bf16.mxu0 %v3238_v4 }
  0x5b   :  { %2405 = vmatpush3.bf16.msra.mxu1 %v3279_v20 }
  0x5c   :  { %2406 = vmatprep.subr.bf16.mxu1 %v2883_v40 }
  0x5d   :  { %2386 = vmatpush1.bf16.msra.mxu0 %v3264_v13 }
  0x5e   :  { %2388 = vmatprep.subr.bf16.mxu0 %v3270_v15 }
  0x5f   :  { %2408 = vmatpush3.bf16.msra.mxu1 %v3296_v24 }
  0x60   :  { %2409 = vmatprep.subr.bf16.mxu1 %v2883_v40 }
  0x61   :  { %2390 = vmatpush1.bf16.msra.mxu0 %v3292_v23 }
  0x62   :  { %2416 = vmatprep.subr.bf16.mxu0 %v3066_v9 }
  0x63   :  { %2411 = vmatpush3.bf16.msra.mxu1 %v3309_v29 }
  0x64   :  { %2412 = vmatprep.subr.bf16.mxu1 %v2883_v40 }
  0x67   :  { %2414 = vmatpush3.bf16.msra.mxu1 %v3323_v32 }
  0x68   :  { %2447 = vmatprep.subr.bf16.mxu1 %v2883_v40 }
  0xfd   :  { %v1949_v42 = vpop.f32.mrb[0].mxu1 }
  0xfe   :  { %v3364_v43 = vadd.f32 %v1949_v42, %v94_v39  ;;  %v277_v44 = vpop.f32.mrb[1].mxu1 }
 0x101   :  { %v1952_v47 = vpop.f32.mrb[2].mxu1 }
 0x102   :  { %v3366_v48 = vadd.f32 %v1952_v47, %v94_v39  ;;  %v287_v49 = vpop.f32.mrb[3].mxu1 }
 0x103   :  { %v3368_v50 = vadd.f32 %v287_v49, %v94_v39 }
 0x105   :  { %v1955_v52 = vpop.f32.mrb[4].mxu1 }
 0x106   :  { %v3370_v53 = vadd.f32 %v1955_v52, %v94_v39  ;;  %v297_v54 = vpop.f32.mrb[5].mxu1  ;;  %v278_v52 = vadd.f32 %v277_v44, %v94_v39 }
 0x107   :  { %v3372_v57 = vadd.f32 %v297_v54, %v94_v39 }
 0x109   :  { %v1958_v60 = vpop.f32.mrb[6].mxu1 }
 0x10a   :  { %v3377_v62 = vadd.f32 %v1958_v60, %v94_v39  ;;  %v307_v63 = vpop.f32.mrb[7].mxu1 }
 0x10b   :  { %v3379_v2 = vadd.f32 %v307_v63, %v94_v39 }
 0x117   :  { %v475_v12 = vpop.f32.mrb[0].mxu0 }
 0x118   :  { %v2752_v16 = vadd.f32 %v3381_v11, %v475_v12  ;;  %v477_v19 = vpop.f32.mrb[1].mxu0 }
 0x119   :  { %v2754_v22 = vadd.f32 %v3383_v14, %v477_v19 }
 0x11a   :  { %v1739_v21 = vmul.f32 -1.442695, %v2752_v16 }
 0x11b   :  { %v1740_v27 = vmul.f32 -1.442695, %v2754_v22 }
 0x11c   :  { %2802 = vpow2.f32 %v1739_v21 }
 0x11d   :  { %v546_v28 = vpop.f32.mrb[8].mxu1  ;;  %2804 = vpow2.f32 %v1740_v27 }
 0x11e   :  { %v1993_v30 = vpop.f32.mrb[9].mxu1  ;;  %v547_v47 = vadd.f32 %v546_v28, %v3387_v36 }
 0x126   :  { %v2803_v31 = vpop.eup %2802 }
 0x127   :  { %v554_v33 = vadd.f32 1.0, %v2803_v31  ;;  %v2805_v38 = vpop.eup %2804 }
 0x128   :  { %v561_v42 = vadd.f32 1.0, %v2805_v38 }
 0x129   :  { %2806 = vrcp.f32 %v554_v33 }
 0x12a   :  { %2808 = vrcp.f32 %v561_v42 }
 0x133   :  { %v2807_v49 = vpop.eup %2806 }
 0x134   :  { %v564_v54 = vmul.f32 %v2807_v49, %v547_v47  ;;  %v2809_v60 = vpop.eup %2808 }
 0x135   :  { %v567_v63 = vsub.f32 1.0, %v2809_v60  ;;  %v569_v6 = vmul.f32 0.0, %v2809_v60 }
 0x136   :  { %v565_v58 = vadd.f32 %v564_v54, %v278_v52 }
 0x138   :  { %2810 = vtanh.f32 %v565_v58 }
 0x142   :  { %v2811_v0 = vpop.eup %2810 }
 0x143   :  { %v568_v5 = vmul.f32 %v2811_v0, %v567_v63 }
 0x145   :  { %v3390_v7 = vadd.f32 %v569_v6, %v568_v5 }
 0x147   :  { %571 = vst [vmem:[%s3685_s5] sm:$0xff] %v3390_v7  ;;  %640 = vmatmul.mubr.f32.vlgmr.msra.gmra.mrb[2].mxu0 %v3390_v7  ;;  %2027 = vmatmul.mubr.f32.vlgmr.msra.gmra.mrb[10].mxu1 %v3390_v7 }
 0x148   :  { %2418 = vmatpush1.bf16.msra.mxu0 %v3086_v17  ;;  %2449 = vmatpush3.bf16.msra.mxu1 %v3155_v41 }
 0x149   :  { %2420 = vmatprep.subr.bf16.mxu0 %v3089_v18  ;;  %2450 = vmatprep.subr.bf16.mxu1 %v2883_v40 }
 0x14a   :  { %805 = vmatprep.mubr.f32.mxu0 %v2882_v3  ;;  %2061 = vmatprep.mubr.msk.f32.mxu1 %vm2884_vm0, %v2882_v3 }
 0x14c   :  { %2422 = vmatpush1.bf16.msra.mxu0 %v3109_v25  ;;  %2452 = vmatpush3.bf16.msra.mxu1 %v3186_v51 }
 0x14d   :  { %2424 = vmatprep.subr.bf16.mxu0 %v3112_v26  ;;  %2453 = vmatprep.subr.bf16.mxu1 %v2883_v40 }
 0x150   :  { %2426 = vmatpush1.bf16.msra.mxu0 %v3137_v34  ;;  %2455 = vmatpush3.bf16.msra.mxu1 %v3218_v61 }
 0x151   :  { %2428 = vmatprep.subr.bf16.mxu0 %v3140_v35  ;;  %2456 = vmatprep.subr.bf16.mxu1 %v2883_v40 }
 0x154   :  { %2430 = vmatpush1.bf16.msra.mxu0 %v3168_v45  ;;  %2458 = vmatpush3.bf16.msra.mxu1 %v3253_v10 }
 0x155   :  { %2432 = vmatprep.subr.bf16.mxu0 %v3171_v46  ;;  %2459 = vmatprep.subr.bf16.mxu1 %v2883_v40 }
 0x158   :  { %2434 = vmatpush1.bf16.msra.mxu0 %v3200_v55  ;;  %2461 = vmatpush3.bf16.msra.mxu1 %v3279_v20 }
 0x159   :  { %2436 = vmatprep.subr.bf16.mxu0 %v3203_v56  ;;  %2462 = vmatprep.subr.bf16.mxu1 %v2883_v40 }
 0x15c   :  { %2438 = vmatpush1.bf16.msra.mxu0 %v3232_v1  ;;  %2464 = vmatpush3.bf16.msra.mxu1 %v3296_v24 }
 0x15d   :  { %2440 = vmatprep.subr.bf16.mxu0 %v3238_v4  ;;  %2465 = vmatprep.subr.bf16.mxu1 %v2883_v40 }
 0x160   :  { %2442 = vmatpush1.bf16.msra.mxu0 %v3264_v13  ;;  %2467 = vmatpush3.bf16.msra.mxu1 %v3309_v29 }
 0x161   :  { %2444 = vmatprep.subr.bf16.mxu0 %v3270_v15  ;;  %2468 = vmatprep.subr.bf16.mxu1 %v2883_v40 }
 0x164   :  { %2446 = vmatpush1.bf16.msra.mxu0 %v3292_v23  ;;  %2470 = vmatpush3.bf16.msra.mxu1 %v3323_v32 }
 0x165   :  { %2472 = vmatprep.subr.bf16.mxu0 %v3066_v9  ;;  %2503 = vmatprep.subr.bf16.mxu1 %v2883_v40 }
 0x21a   :  { %v641_v37 = vpop.f32.mrb[2].mxu0  ;;  %v712_v39 = vpop.f32.mrb[10].mxu1 }
 0x21b   :  { %v2756_v44 = vadd.f32 %v3381_v11, %v641_v37  ;;  %v643_v59 = vpop.f32.mrb[3].mxu0  ;;  %v2028_v8 = vpop.f32.mrb[11].mxu1  ;;  %v713_v30 = vadd.f32 %v712_v39, %v3387_v36 }
 0x21c   :  { %v2758_v16 = vadd.f32 %v3383_v14, %v643_v59 }
 0x21d   :  { %v1741_v12 = vmul.f32 -1.442695, %v2756_v44 }
 0x21e   :  { %v1742_v19 = vmul.f32 -1.442695, %v2758_v16 }
 0x21f   :  { %2812 = vpow2.f32 %v1741_v12 }
 0x220   :  { %2814 = vpow2.f32 %v1742_v19 }
 0x229   :  { %v2813_v21 = vpop.eup %2812 }
 0x22a   :  { %v720_v22 = vadd.f32 1.0, %v2813_v21  ;;  %v2815_v27 = vpop.eup %2814 }
 0x22b   :  { %v727_v28 = vadd.f32 1.0, %v2815_v27 }
 0x22c   :  { %2816 = vrcp.f32 %v720_v22 }
 0x22d   :  { %2818 = vrcp.f32 %v727_v28 }
 0x236   :  { %v2817_v31 = vpop.eup %2816 }
 0x237   :  { %v730_v33 = vmul.f32 %v2817_v31, %v713_v30  ;;  %v2819_v42 = vpop.eup %2818 }
 0x238   :  { %v733_v47 = vsub.f32 1.0, %v2819_v42  ;;  %v735_v54 = vmul.f32 %v2819_v42, %v3390_v7 }
 0x239   :  { %v731_v38 = vadd.f32 %v730_v33, %v3364_v43 }
 0x23b   :  { %2820 = vtanh.f32 %v731_v38 }
 0x245   :  { %v2821_v49 = vpop.eup %2820 }
 0x246   :  { %v734_v52 = vmul.f32 %v2821_v49, %v733_v47 }
 0x248   :  { %v3438_v58 = vadd.f32 %v735_v54, %v734_v52 }
 0x24a   :  { %737 = vst [vmem:[%s3685_s5 + $0x8] sm:$0xff] %v3438_v58  ;;  %806 = vmatmul.mubr.f32.vlgmr.msra.gmra.mrb[4].mxu0 %v3438_v58  ;;  %2062 = vmatmul.mubr.f32.vlgmr.msra.gmra.mrb[12].mxu1 %v3438_v58 }
 0x24b   :  { %2474 = vmatpush1.bf16.msra.mxu0 %v3086_v17  ;;  %2505 = vmatpush3.bf16.msra.mxu1 %v3155_v41 }
 0x24c   :  { %2476 = vmatprep.subr.bf16.mxu0 %v3089_v18  ;;  %2506 = vmatprep.subr.bf16.mxu1 %v2883_v40 }
 0x24d   :  { %971 = vmatprep.mubr.f32.mxu0 %v2882_v3  ;;  %2096 = vmatprep.mubr.msk.f32.mxu1 %vm2884_vm0, %v2882_v3 }
 0x24f   :  { %2478 = vmatpush1.bf16.msra.mxu0 %v3109_v25  ;;  %2508 = vmatpush3.bf16.msra.mxu1 %v3186_v51 }
 0x250   :  { %2480 = vmatprep.subr.bf16.mxu0 %v3112_v26  ;;  %2509 = vmatprep.subr.bf16.mxu1 %v2883_v40 }
 0x253   :  { %2482 = vmatpush1.bf16.msra.mxu0 %v3137_v34  ;;  %2511 = vmatpush3.bf16.msra.mxu1 %v3218_v61 }
 0x254   :  { %2484 = vmatprep.subr.bf16.mxu0 %v3140_v35  ;;  %2512 = vmatprep.subr.bf16.mxu1 %v2883_v40 }
 0x257   :  { %2486 = vmatpush1.bf16.msra.mxu0 %v3168_v45  ;;  %2514 = vmatpush3.bf16.msra.mxu1 %v3253_v10 }
 0x258   :  { %2488 = vmatprep.subr.bf16.mxu0 %v3171_v46  ;;  %2515 = vmatprep.subr.bf16.mxu1 %v2883_v40 }
 0x25b   :  { %2490 = vmatpush1.bf16.msra.mxu0 %v3200_v55  ;;  %2517 = vmatpush3.bf16.msra.mxu1 %v3279_v20 }
 0x25c   :  { %2492 = vmatprep.subr.bf16.mxu0 %v3203_v56  ;;  %2518 = vmatprep.subr.bf16.mxu1 %v2883_v40 }
 0x25f   :  { %2494 = vmatpush1.bf16.msra.mxu0 %v3232_v1  ;;  %2520 = vmatpush3.bf16.msra.mxu1 %v3296_v24 }
 0x260   :  { %2496 = vmatprep.subr.bf16.mxu0 %v3238_v4  ;;  %2521 = vmatprep.subr.bf16.mxu1 %v2883_v40 }
 0x263   :  { %2498 = vmatpush1.bf16.msra.mxu0 %v3264_v13  ;;  %2523 = vmatpush3.bf16.msra.mxu1 %v3309_v29 }
 0x264   :  { %2500 = vmatprep.subr.bf16.mxu0 %v3270_v15  ;;  %2524 = vmatprep.subr.bf16.mxu1 %v2883_v40 }
 0x267   :  { %2502 = vmatpush1.bf16.msra.mxu0 %v3292_v23  ;;  %2526 = vmatpush3.bf16.msra.mxu1 %v3323_v32 }
 0x268   :  { %2528 = vmatprep.subr.bf16.mxu0 %v3066_v9  ;;  %2559 = vmatprep.subr.bf16.mxu1 %v2883_v40 }
 0x31d   :  { %v807_v43 = vpop.f32.mrb[4].mxu0  ;;  %v878_v60 = vpop.f32.mrb[12].mxu1 }
 0x31e   :  { %v2760_v63 = vadd.f32 %v3381_v11, %v807_v43  ;;  %v809_v0 = vpop.f32.mrb[5].mxu0  ;;  %v2063_v5 = vpop.f32.mrb[13].mxu1  ;;  %v879_v12 = vadd.f32 %v878_v60, %v3387_v36 }
 0x31f   :  { %v2762_v7 = vadd.f32 %v3383_v14, %v809_v0 }
 0x320   :  { %v1743_v6 = vmul.f32 -1.442695, %v2760_v63 }
 0x321   :  { %v1744_v37 = vmul.f32 -1.442695, %v2762_v7 }
 0x322   :  { %2822 = vpow2.f32 %v1743_v6 }
 0x323   :  { %2824 = vpow2.f32 %v1744_v37 }
 0x32c   :  { %v2823_v39 = vpop.eup %2822 }
 0x32d   :  { %v886_v44 = vadd.f32 1.0, %v2823_v39  ;;  %v2825_v59 = vpop.eup %2824 }
 0x32e   :  { %v893_v8 = vadd.f32 1.0, %v2825_v59 }
 0x32f   :  { %2826 = vrcp.f32 %v886_v44 }
 0x330   :  { %2828 = vrcp.f32 %v893_v8 }
 0x339   :  { %v2827_v16 = vpop.eup %2826 }
 0x33a   :  { %v896_v19 = vmul.f32 %v2827_v16, %v879_v12  ;;  %v2829_v22 = vpop.eup %2828 }
 0x33b   :  { %v899_v27 = vsub.f32 1.0, %v2829_v22  ;;  %v901_v31 = vmul.f32 %v2829_v22, %v3438_v58 }
 0x33c   :  { %v897_v21 = vadd.f32 %v896_v19, %v3368_v50 }
 0x33e   :  { %2830 = vtanh.f32 %v897_v21 }
 0x348   :  { %v2831_v28 = vpop.eup %2830 }
 0x349   :  { %v900_v30 = vmul.f32 %v2831_v28, %v899_v27 }
 0x34b   :  { %v3486_v33 = vadd.f32 %v901_v31, %v900_v30 }
 0x34d   :  { %903 = vst [vmem:[%s3685_s5 + $0x10] sm:$0xff] %v3486_v33  ;;  %972 = vmatmul.mubr.f32.vlgmr.msra.gmra.mrb[6].mxu0 %v3486_v33  ;;  %2097 = vmatmul.mubr.f32.vlgmr.msra.gmra.mrb[14].mxu1 %v3486_v33 }
 0x34e   :  { %2530 = vmatpush1.bf16.msra.mxu0 %v3086_v17  ;;  %2561 = vmatpush3.bf16.msra.mxu1 %v3155_v41 }
 0x34f   :  { %2532 = vmatprep.subr.bf16.mxu0 %v3089_v18  ;;  %2562 = vmatprep.subr.bf16.mxu1 %v2883_v40 }
 0x350   :  { %1137 = vmatprep.mubr.f32.mxu0 %v2882_v3  ;;  %2131 = vmatprep.mubr.msk.f32.mxu1 %vm2884_vm0, %v2882_v3 }
 0x352   :  { %2534 = vmatpush1.bf16.msra.mxu0 %v3109_v25  ;;  %2564 = vmatpush3.bf16.msra.mxu1 %v3186_v51 }
 0x353   :  { %2536 = vmatprep.subr.bf16.mxu0 %v3112_v26  ;;  %2565 = vmatprep.subr.bf16.mxu1 %v2883_v40 }
 0x356   :  { %2538 = vmatpush1.bf16.msra.mxu0 %v3137_v34  ;;  %2567 = vmatpush3.bf16.msra.mxu1 %v3218_v61 }
 0x357   :  { %2540 = vmatprep.subr.bf16.mxu0 %v3140_v35  ;;  %2568 = vmatprep.subr.bf16.mxu1 %v2883_v40 }
 0x35a   :  { %2542 = vmatpush1.bf16.msra.mxu0 %v3168_v45  ;;  %2570 = vmatpush3.bf16.msra.mxu1 %v3253_v10 }
 0x35b   :  { %2544 = vmatprep.subr.bf16.mxu0 %v3171_v46  ;;  %2571 = vmatprep.subr.bf16.mxu1 %v2883_v40 }
 0x35e   :  { %2546 = vmatpush1.bf16.msra.mxu0 %v3200_v55  ;;  %2573 = vmatpush3.bf16.msra.mxu1 %v3279_v20 }
 0x35f   :  { %2548 = vmatprep.subr.bf16.mxu0 %v3203_v56  ;;  %2574 = vmatprep.subr.bf16.mxu1 %v2883_v40 }
 0x362   :  { %2550 = vmatpush1.bf16.msra.mxu0 %v3232_v1  ;;  %2576 = vmatpush3.bf16.msra.mxu1 %v3296_v24 }
 0x363   :  { %2552 = vmatprep.subr.bf16.mxu0 %v3238_v4  ;;  %2577 = vmatprep.subr.bf16.mxu1 %v2883_v40 }
 0x366   :  { %2554 = vmatpush1.bf16.msra.mxu0 %v3264_v13  ;;  %2579 = vmatpush3.bf16.msra.mxu1 %v3309_v29 }
 0x367   :  { %2556 = vmatprep.subr.bf16.mxu0 %v3270_v15  ;;  %2580 = vmatprep.subr.bf16.mxu1 %v2883_v40 }
 0x36a   :  { %2558 = vmatpush1.bf16.msra.mxu0 %v3292_v23  ;;  %2582 = vmatpush3.bf16.msra.mxu1 %v3323_v32 }
 0x36b   :  { %2584 = vmatprep.subr.bf16.mxu0 %v3066_v9  ;;  %2615 = vmatprep.subr.bf16.mxu1 %v2883_v40 }
 0x420   :  { %v973_v50 = vpop.f32.mrb[6].mxu0  ;;  %v1044_v38 = vpop.f32.mrb[14].mxu1 }
 0x421   :  { %v2764_v42 = vadd.f32 %v3381_v11, %v973_v50  ;;  %v975_v47 = vpop.f32.mrb[7].mxu0  ;;  %v2098_v49 = vpop.f32.mrb[15].mxu1  ;;  %v1045_v5 = vadd.f32 %v1044_v38, %v3387_v36 }
 0x422   :  { %v2766_v54 = vadd.f32 %v3383_v14, %v975_v47 }
 0x423   :  { %v1745_v52 = vmul.f32 -1.442695, %v2764_v42 }
 0x424   :  { %v1746_v58 = vmul.f32 -1.442695, %v2766_v54 }
 0x425   :  { %2832 = vpow2.f32 %v1745_v52 }
 0x426   :  { %2834 = vpow2.f32 %v1746_v58 }
 0x42f   :  { %v2833_v43 = vpop.eup %2832 }
 0x430   :  { %v1052_v60 = vadd.f32 1.0, %v2833_v43  ;;  %v2835_v63 = vpop.eup %2834 }
 0x431   :  { %v1059_v0 = vadd.f32 1.0, %v2835_v63 }
 0x432   :  { %2836 = vrcp.f32 %v1052_v60 }
 0x433   :  { %2838 = vrcp.f32 %v1059_v0 }
 0x43c   :  { %v2837_v6 = vpop.eup %2836 }
 0x43d   :  { %v1062_v7 = vmul.f32 %v2837_v6, %v1045_v5  ;;  %v2839_v39 = vpop.eup %2838 }
 0x43e   :  { %v1065_v44 = vsub.f32 1.0, %v2839_v39  ;;  %v1067_v12 = vmul.f32 %v2839_v39, %v3486_v33 }
 0x43f   :  { %v1063_v37 = vadd.f32 %v1062_v7, %v3366_v48 }
 0x441   :  { %2840 = vtanh.f32 %v1063_v37 }
 0x44b   :  { %v2841_v59 = vpop.eup %2840 }
 0x44c   :  { %v1066_v8 = vmul.f32 %v2841_v59, %v1065_v44 }
 0x44e   :  { %v3534_v16 = vadd.f32 %v1067_v12, %v1066_v8 }
 0x450   :  { %1069 = vst [vmem:[%s3685_s5 + $0x18] sm:$0xff] %v3534_v16  ;;  %1138 = vmatmul.mubr.f32.vlgmr.msra.gmra.mrb[8].mxu0 %v3534_v16  ;;  %2132 = vmatmul.mubr.f32.vlgmr.msra.gmra.mrb[16].mxu1 %v3534_v16 }
 0x451   :  { %2586 = vmatpush1.bf16.msra.mxu0 %v3086_v17  ;;  %2617 = vmatpush3.bf16.msra.mxu1 %v3155_v41 }
 0x452   :  { %2588 = vmatprep.subr.bf16.mxu0 %v3089_v18  ;;  %2618 = vmatprep.subr.bf16.mxu1 %v2883_v40 }
 0x453   :  { %1303 = vmatprep.mubr.f32.mxu0 %v2882_v3  ;;  %2166 = vmatprep.mubr.msk.f32.mxu1 %vm2884_vm0, %v2882_v3 }
 0x455   :  { %2590 = vmatpush1.bf16.msra.mxu0 %v3109_v25  ;;  %2620 = vmatpush3.bf16.msra.mxu1 %v3186_v51 }
 0x456   :  { %2592 = vmatprep.subr.bf16.mxu0 %v3112_v26  ;;  %2621 = vmatprep.subr.bf16.mxu1 %v2883_v40 }
 0x459   :  { %2594 = vmatpush1.bf16.msra.mxu0 %v3137_v34  ;;  %2623 = vmatpush3.bf16.msra.mxu1 %v3218_v61 }
 0x45a   :  { %2596 = vmatprep.subr.bf16.mxu0 %v3140_v35  ;;  %2624 = vmatprep.subr.bf16.mxu1 %v2883_v40 }
 0x45d   :  { %2598 = vmatpush1.bf16.msra.mxu0 %v3168_v45  ;;  %2626 = vmatpush3.bf16.msra.mxu1 %v3253_v10 }
 0x45e   :  { %2600 = vmatprep.subr.bf16.mxu0 %v3171_v46  ;;  %2627 = vmatprep.subr.bf16.mxu1 %v2883_v40 }
 0x461   :  { %2602 = vmatpush1.bf16.msra.mxu0 %v3200_v55  ;;  %2629 = vmatpush3.bf16.msra.mxu1 %v3279_v20 }
 0x462   :  { %2604 = vmatprep.subr.bf16.mxu0 %v3203_v56  ;;  %2630 = vmatprep.subr.bf16.mxu1 %v2883_v40 }
 0x465   :  { %2606 = vmatpush1.bf16.msra.mxu0 %v3232_v1  ;;  %2632 = vmatpush3.bf16.msra.mxu1 %v3296_v24 }
 0x466   :  { %2608 = vmatprep.subr.bf16.mxu0 %v3238_v4  ;;  %2633 = vmatprep.subr.bf16.mxu1 %v2883_v40 }
 0x469   :  { %2610 = vmatpush1.bf16.msra.mxu0 %v3264_v13  ;;  %2635 = vmatpush3.bf16.msra.mxu1 %v3309_v29 }
 0x46a   :  { %2612 = vmatprep.subr.bf16.mxu0 %v3270_v15  ;;  %2636 = vmatprep.subr.bf16.mxu1 %v2883_v40 }
 0x46d   :  { %2614 = vmatpush1.bf16.msra.mxu0 %v3292_v23  ;;  %2638 = vmatpush3.bf16.msra.mxu1 %v3323_v32 }
 0x46e   :  { %2640 = vmatprep.subr.bf16.mxu0 %v3066_v9  ;;  %2671 = vmatprep.subr.bf16.mxu1 %v2883_v40 }
 0x523   :  { %v1139_v48 = vpop.f32.mrb[8].mxu0  ;;  %v1210_v19 = vpop.f32.mrb[16].mxu1 }
 0x524   :  { %v2768_v21 = vadd.f32 %v3381_v11, %v1139_v48  ;;  %v1141_v22 = vpop.f32.mrb[9].mxu0  ;;  %v2133_v27 = vpop.f32.mrb[17].mxu1  ;;  %v1211_v47 = vadd.f32 %v1210_v19, %v3387_v36 }
 0x525   :  { %v2770_v30 = vadd.f32 %v3383_v14, %v1141_v22 }
 0x526   :  { %v1747_v28 = vmul.f32 -1.442695, %v2768_v21 }
 0x527   :  { %v1748_v31 = vmul.f32 -1.442695, %v2770_v30 }
 0x528   :  { %2842 = vpow2.f32 %v1747_v28 }
 0x529   :  { %2844 = vpow2.f32 %v1748_v31 }
 0x532   :  { %v2843_v33 = vpop.eup %2842 }
 0x533   :  { %v1218_v50 = vadd.f32 1.0, %v2843_v33  ;;  %v2845_v38 = vpop.eup %2844 }
 0x534   :  { %v1225_v42 = vadd.f32 1.0, %v2845_v38 }
 0x535   :  { %2846 = vrcp.f32 %v1218_v50 }
 0x536   :  { %2848 = vrcp.f32 %v1225_v42 }
 0x53f   :  { %v2847_v49 = vpop.eup %2846 }
 0x540   :  { %v1228_v52 = vmul.f32 %v2847_v49, %v1211_v47  ;;  %v2849_v58 = vpop.eup %2848 }
 0x541   :  { %v1231_v43 = vsub.f32 1.0, %v2849_v58  ;;  %v1233_v0 = vmul.f32 %v2849_v58, %v3534_v16 }
 0x542   :  { %v1229_v54 = vadd.f32 %v1228_v52, %v3372_v57 }
 0x544   :  { %2850 = vtanh.f32 %v1229_v54 }
 0x54e   :  { %v2851_v60 = vpop.eup %2850 }
 0x54f   :  { %v1232_v63 = vmul.f32 %v2851_v60, %v1231_v43 }
 0x551   :  { %v3582_v5 = vadd.f32 %v1233_v0, %v1232_v63 }
 0x553   :  { %1235 = vst [vmem:[%s3685_s5 + $0x20] sm:$0xff] %v3582_v5  ;;  %1304 = vmatmul.mubr.f32.vlgmr.msra.gmra.mrb[10].mxu0 %v3582_v5  ;;  %2167 = vmatmul.mubr.f32.vlgmr.msra.gmra.mrb[18].mxu1 %v3582_v5 }
 0x554   :  { %2642 = vmatpush1.bf16.msra.mxu0 %v3086_v17  ;;  %2673 = vmatpush3.bf16.msra.mxu1 %v3155_v41 }
 0x555   :  { %2644 = vmatprep.subr.bf16.mxu0 %v3089_v18  ;;  %2674 = vmatprep.subr.bf16.mxu1 %v2883_v40 }
 0x556   :  { %1469 = vmatprep.mubr.f32.mxu0 %v2882_v3  ;;  %2201 = vmatprep.mubr.msk.f32.mxu1 %vm2884_vm0, %v2882_v3 }
 0x558   :  { %2646 = vmatpush1.bf16.msra.mxu0 %v3109_v25  ;;  %2676 = vmatpush3.bf16.msra.mxu1 %v3186_v51 }
 0x559   :  { %2648 = vmatprep.subr.bf16.mxu0 %v3112_v26  ;;  %2677 = vmatprep.subr.bf16.mxu1 %v2883_v40 }
 0x55c   :  { %2650 = vmatpush1.bf16.msra.mxu0 %v3137_v34  ;;  %2679 = vmatpush3.bf16.msra.mxu1 %v3218_v61 }
 0x55d   :  { %2652 = vmatprep.subr.bf16.mxu0 %v3140_v35  ;;  %2680 = vmatprep.subr.bf16.mxu1 %v2883_v40 }
 0x560   :  { %2654 = vmatpush1.bf16.msra.mxu0 %v3168_v45  ;;  %2682 = vmatpush3.bf16.msra.mxu1 %v3253_v10 }
 0x561   :  { %2656 = vmatprep.subr.bf16.mxu0 %v3171_v46  ;;  %2683 = vmatprep.subr.bf16.mxu1 %v2883_v40 }
 0x564   :  { %2658 = vmatpush1.bf16.msra.mxu0 %v3200_v55  ;;  %2685 = vmatpush3.bf16.msra.mxu1 %v3279_v20 }
 0x565   :  { %2660 = vmatprep.subr.bf16.mxu0 %v3203_v56  ;;  %2686 = vmatprep.subr.bf16.mxu1 %v2883_v40 }
 0x568   :  { %2662 = vmatpush1.bf16.msra.mxu0 %v3232_v1  ;;  %2688 = vmatpush3.bf16.msra.mxu1 %v3296_v24 }
 0x569   :  { %2664 = vmatprep.subr.bf16.mxu0 %v3238_v4  ;;  %2689 = vmatprep.subr.bf16.mxu1 %v2883_v40 }
 0x56c   :  { %2666 = vmatpush1.bf16.msra.mxu0 %v3264_v13  ;;  %2691 = vmatpush3.bf16.msra.mxu1 %v3309_v29 }
 0x56d   :  { %2668 = vmatprep.subr.bf16.mxu0 %v3270_v15  ;;  %2692 = vmatprep.subr.bf16.mxu1 %v2883_v40 }
 0x570   :  { %2670 = vmatpush1.bf16.msra.mxu0 %v3292_v23  ;;  %2694 = vmatpush3.bf16.msra.mxu1 %v3323_v32 }
 0x571   :  { %2696 = vmatprep.subr.bf16.mxu0 %v3066_v9  ;;  %2727 = vmatprep.subr.bf16.mxu1 %v2883_v40 }
 0x626   :  { %v1305_v57 = vpop.f32.mrb[10].mxu0  ;;  %v1376_v6 = vpop.f32.mrb[18].mxu1 }
 0x627   :  { %v2772_v7 = vadd.f32 %v3381_v11, %v1305_v57  ;;  %v1307_v37 = vpop.f32.mrb[11].mxu0  ;;  %v2168_v39 = vpop.f32.mrb[19].mxu1  ;;  %v1377_v9 = vadd.f32 %v1376_v6, %v3387_v36 }
 0x628   :  { %v2774_v59 = vadd.f32 %v3383_v14, %v1307_v37 }
 0x629   :  { %v1749_v44 = vmul.f32 -1.442695, %v2772_v7 }
 0x62a   :  { %v1750_v8 = vmul.f32 -1.442695, %v2774_v59 }
 0x62b   :  { %2852 = vpow2.f32 %v1749_v44 }
 0x62c   :  { %2854 = vpow2.f32 %v1750_v8 }
 0x635   :  { %v2853_v12 = vpop.eup %2852 }
 0x636   :  { %v1384_v16 = vadd.f32 1.0, %v2853_v12  ;;  %v2855_v48 = vpop.eup %2854 }
 0x637   :  { %v1391_v19 = vadd.f32 1.0, %v2855_v48 }
 0x638   :  { %2856 = vrcp.f32 %v1384_v16 }
 0x639   :  { %2858 = vrcp.f32 %v1391_v19 }
 0x642   :  { %v2857_v21 = vpop.eup %2856 }
 0x643   :  { %v1394_v22 = vmul.f32 %v2857_v21, %v1377_v9  ;;  %v2859_v28 = vpop.eup %2858 }
 0x644   :  { %v1397_v30 = vsub.f32 1.0, %v2859_v28  ;;  %v1399_v50 = vmul.f32 %v2859_v28, %v3582_v5 }
 0x645   :  { %v1395_v27 = vadd.f32 %v1394_v22, %v3370_v53 }
 0x647   :  { %2860 = vtanh.f32 %v1395_v27 }
 0x651   :  { %v2861_v31 = vpop.eup %2860 }
 0x652   :  { %v1398_v33 = vmul.f32 %v2861_v31, %v1397_v30 }
 0x654   :  { %v1400_v38 = vadd.f32 %v1399_v50, %v1398_v33 }
 0x656   :  { %1401 = vst [vmem:[%s3685_s5 + $0x28] sm:$0xff] %v1400_v38  ;;  %1470 = vmatmul.mubr.f32.vlgmr.msra.gmra.mrb[12].mxu0 %v1400_v38  ;;  %2202 = vmatmul.mubr.f32.vlgmr.msra.gmra.mrb[20].mxu1 %v1400_v38 }
 0x657   :  { %2698 = vmatpush1.bf16.msra.mxu0 %v3086_v17  ;;  %2729 = vmatpush3.bf16.msra.mxu1 %v3155_v41 }
 0x658   :  { %2700 = vmatprep.subr.bf16.mxu0 %v3089_v18  ;;  %2730 = vmatprep.subr.bf16.mxu1 %v2883_v40 }
 0x659   :  { %1635 = vmatprep.mubr.f32.mxu0 %v2882_v3  ;;  %2236 = vmatprep.mubr.msk.f32.mxu1 %vm2884_vm0, %v2882_v3 }
 0x65b   :  { %2702 = vmatpush1.bf16.msra.mxu0 %v3109_v25  ;;  %2732 = vmatpush3.bf16.msra.mxu1 %v3186_v51 }
 0x65c   :  { %2704 = vmatprep.subr.bf16.mxu0 %v3112_v26  ;;  %2733 = vmatprep.subr.bf16.mxu1 %v2883_v40 }
 0x65f   :  { %2706 = vmatpush1.bf16.msra.mxu0 %v3137_v34  ;;  %2735 = vmatpush3.bf16.msra.mxu1 %v3218_v61 }
 0x660   :  { %2708 = vmatprep.subr.bf16.mxu0 %v3140_v35  ;;  %2736 = vmatprep.subr.bf16.mxu1 %v2883_v40 }
 0x663   :  { %2710 = vmatpush1.bf16.msra.mxu0 %v3168_v45  ;;  %2738 = vmatpush3.bf16.msra.mxu1 %v3253_v10 }
 0x664   :  { %2712 = vmatprep.subr.bf16.mxu0 %v3171_v46  ;;  %2739 = vmatprep.subr.bf16.mxu1 %v2883_v40 }
 0x667   :  { %2714 = vmatpush1.bf16.msra.mxu0 %v3200_v55  ;;  %2741 = vmatpush3.bf16.msra.mxu1 %v3279_v20 }
 0x668   :  { %2716 = vmatprep.subr.bf16.mxu0 %v3203_v56  ;;  %2742 = vmatprep.subr.bf16.mxu1 %v2883_v40 }
 0x66b   :  { %2718 = vmatpush1.bf16.msra.mxu0 %v3232_v1  ;;  %2744 = vmatpush3.bf16.msra.mxu1 %v3296_v24 }
 0x66c   :  { %2720 = vmatprep.subr.bf16.mxu0 %v3238_v4  ;;  %2745 = vmatprep.subr.bf16.mxu1 %v2883_v40 }
 0x66f   :  { %2722 = vmatpush1.bf16.msra.mxu0 %v3264_v13  ;;  %2747 = vmatpush3.bf16.msra.mxu1 %v3309_v29 }
 0x670   :  { %2724 = vmatprep.subr.bf16.mxu0 %v3270_v15  ;;  %2748 = vmatprep.subr.bf16.mxu1 %v2883_v40 }
 0x673   :  { %2726 = vmatpush1.bf16.msra.mxu0 %v3292_v23  ;;  %2750 = vmatpush3.bf16.msra.mxu1 %v3323_v32 }
 0x729   :  { %v1471_v3 = vpop.f32.mrb[12].mxu0  ;;  %v1542_v17 = vpop.f32.mrb[20].mxu1 }
 0x72a   :  { %v2776_v18 = vadd.f32 %v3381_v11, %v1471_v3  ;;  %v1473_v25 = vpop.f32.mrb[13].mxu0  ;;  %v2203_v26 = vpop.f32.mrb[21].mxu1  ;;  %v1543_v55 = vadd.f32 %v1542_v17, %v3387_v36 }
 0x72b   :  { %v2778_v35 = vadd.f32 %v3383_v14, %v1473_v25 }
 0x72c   :  { %v1751_v34 = vmul.f32 -1.442695, %v2776_v18 }
 0x72d   :  { %v1752_v41 = vmul.f32 -1.442695, %v2778_v35 }
 0x72e   :  { %2862 = vpow2.f32 %v1751_v34 }
 0x72f   :  { %2864 = vpow2.f32 %v1752_v41 }
 0x738   :  { %v2863_v45 = vpop.eup %2862 }
 0x739   :  { %v1550_v46 = vadd.f32 1.0, %v2863_v45  ;;  %v2865_v40 = vpop.eup %2864 }
 0x73a   :  { %v1557_v51 = vadd.f32 1.0, %v2865_v40 }
 0x73b   :  { %2866 = vrcp.f32 %v1550_v46 }
 0x73c   :  { %2868 = vrcp.f32 %v1557_v51 }
 0x745   :  { %v2867_v56 = vpop.eup %2866 }
 0x746   :  { %v1560_v61 = vmul.f32 %v2867_v56, %v1543_v55  ;;  %v2869_v4 = vpop.eup %2868 }
 0x747   :  { %v1563_v10 = vsub.f32 1.0, %v2869_v4  ;;  %v1565_v20 = vmul.f32 %v2869_v4, %v1400_v38 }
 0x748   :  { %v1561_v1 = vadd.f32 %v1560_v61, %v3379_v2 }
 0x74a   :  { %2870 = vtanh.f32 %v1561_v1 }
 0x754   :  { %v2871_v13 = vpop.eup %2870 }
 0x755   :  { %v1564_v15 = vmul.f32 %v2871_v13, %v1563_v10 }
 0x757   :  { %v1566_v23 = vadd.f32 %v1565_v20, %v1564_v15 }
 0x759   :  { %1567 = vst [vmem:[%s3685_s5 + $0x30] sm:$0xff] %v1566_v23  ;;  %1636 = vmatmul.mubr.f32.vlgmr.msra.gmra.mrb[14].mxu0 %v1566_v23  ;;  %2237 = vmatmul.mubr.f32.vlgmr.msra.gmra.mrb[22].mxu1 %v1566_v23 }
 0x82c   :  { %v1637_v24 = vpop.f32.mrb[14].mxu0  ;;  %v1708_v29 = vpop.f32.mrb[22].mxu1 }
 0x82d   :  { %v2780_v32 = vadd.f32 %v3381_v11, %v1637_v24  ;;  %v1639_v53 = vpop.f32.mrb[15].mxu0  ;;  %v2238_v42 = vpop.f32.mrb[23].mxu1  ;;  %v1709_v60 = vadd.f32 %v1708_v29, %v3387_v36 }
 0x82e   :  { %v2782_v47 = vadd.f32 %v3383_v14, %v1639_v53 }
 0x82f   :  { %v1753_v2 = vmul.f32 -1.442695, %v2780_v32 }
 0x830   :  { %v1754_v49 = vmul.f32 -1.442695, %v2782_v47 }
 0x831   :  { %2872 = vpow2.f32 %v1753_v2 }
 0x832   :  { %2874 = vpow2.f32 %v1754_v49 }
 0x83b   :  { %v2873_v52 = vpop.eup %2872 }
 0x83c   :  { %v1716_v54 = vadd.f32 1.0, %v2873_v52  ;;  %v2875_v58 = vpop.eup %2874 }
 0x83d   :  { %v1723_v43 = vadd.f32 1.0, %v2875_v58 }
 0x83e   :  { %2876 = vrcp.f32 %v1716_v54 }
 0x83f   :  { %2878 = vrcp.f32 %v1723_v43 }
 0x848   :  { %v2877_v63 = vpop.eup %2876 }
 0x849   :  { %v1726_v0 = vmul.f32 %v2877_v63, %v1709_v60  ;;  %v2879_v5 = vpop.eup %2878 }
 0x84a   :  { %v1729_v57 = vsub.f32 1.0, %v2879_v5  ;;  %v1731_v7 = vmul.f32 %v2879_v5, %v1566_v23 }
 0x84b   :  { %v1727_v11 = vadd.f32 %v1726_v0, %v3377_v62 }
 0x84d   :  { %2880 = vtanh.f32 %v1727_v11 }
 0x857   :  { %v2881_v6 = vpop.eup %2880 }
 0x858   :  { %v1730_v14 = vmul.f32 %v2881_v6, %v1729_v57 }
 0x85a   :  { %v1732_v37 = vadd.f32 %v1731_v7, %v1730_v14 }
 0x85c   :  { %1733 = vst [vmem:[%s3685_s5 + $0x38] sm:$0xff] %v1732_v37 }

</bundles_post_ra>
